<compile_context>
chip_gen: v6e
topology: v6e:2x2x1
jax: 0.10.0
libtpu: 0.0.40
codegen_flags: <defaults>
</compile_context>

<pallas_src>
import numpy as np

import jax
import jax.numpy as jnp
from jax.experimental import pallas as pl
from jax.experimental.pallas import tpu as pltpu

MAX_NB = 128  # samples per grid step at full occupancy


def _round_up(v, m):
    return ((v + m - 1) // m) * m


# ---------------------------------------------------------------------------
# Fused forward kernel (built per batch-tile size nb)
# ---------------------------------------------------------------------------
def _make_kernel(nb):
    def kernel(x_ref, B1_ref, b1_ref, B2_ref, b2_ref,
               Wf1_ref, bf1_ref, Wf2_ref, bf2_ref,
               o_ref, y1_ref, xs_ref, y2_ref, f1_ref):
        # x_ref  : (24*nb, 160) bf16  rows = h_out*nb + n, lanes = 32*ky + w_in
        # B1_ref : (160, 256)  bf16   conv1 banded weights
        # B2_ref : (640, 256)  bf16   conv2 banded weights
        # Wf1_ref: (512, 128)  bf16   fc1 ;  Wf2_ref: (128,128) bf16   fc2
        # scratch: y1 (24*nb,256) f32, xs (8*nb,640) bf16,
        #          y2 (8*nb,256) f32, f1 (nb,512) bf16

        # ---- conv1: single banded-Toeplitz matmul (im2col over ky is done
        #      in the wrapper), lanes of y1 = pw*128 + co*12 + j, w_out=2j+pw.
        y1_ref[...] = jnp.dot(x_ref[...], B1_ref[...],
                              preferred_element_type=jnp.float32)

        # ---- 2x2 max-pool + bias + ReLU, scattered straight into the conv2
        #      staging buffer at the 5 ky lane-offsets.  (Adding the per-
        #      channel bias AFTER the max is equivalent to before: max and
        #      ReLU commute with adding a constant.)
        b1 = jnp.broadcast_to(b1_ref[...], (nb, 128))       # hoisted broadcast
        for i in range(12):                                   # pooled row i
            ye = y1_ref[(2 * i) * nb:(2 * i + 1) * nb, :]
            yo = y1_ref[(2 * i + 1) * nb:(2 * i + 2) * nb, :]
            m = jnp.maximum(jnp.maximum(ye[:, 0:128], ye[:, 128:256]),
                            jnp.maximum(yo[:, 0:128], yo[:, 128:256]))
            p = jnp.maximum(m + b1, 0.0).astype(jnp.bfloat16)
            for ky in range(5):                               # conv2 row ky
                h2 = i - ky
                if 0 <= h2 <= 7:
                    xs_ref[h2 * nb:(h2 + 1) * nb,
                           128 * ky:128 * (ky + 1)] = p

        # ---- conv2: single K=640 matmul (Dropout2d is identity at inference)
        y2_ref[...] = jnp.dot(xs_ref[...], B2_ref[...],
                              preferred_element_type=jnp.float32)

        # ---- 2x2 max-pool + bias + ReLU -> fc1 staging (lane offset 128*i)
        b2 = jnp.broadcast_to(b2_ref[...], (nb, 128))        # hoisted broadcast
        for i in range(4):
            ye = y2_ref[(2 * i) * nb:(2 * i + 1) * nb, :]
            yo = y2_ref[(2 * i + 1) * nb:(2 * i + 2) * nb, :]
            m = jnp.maximum(jnp.maximum(ye[:, 0:128], ye[:, 128:256]),
                            jnp.maximum(yo[:, 0:128], yo[:, 128:256]))
            f1_ref[:, 128 * i:128 * (i + 1)] = (
                jnp.maximum(m + b2, 0.0).astype(jnp.bfloat16))

        # ---- fc1 (+ReLU) as one K=512 matmul, then fc2.  F.dropout identity.
        h1 = jnp.maximum(
            jnp.dot(f1_ref[...], Wf1_ref[...],
                    preferred_element_type=jnp.float32) + bf1_ref[...], 0.0)
        o_ref[...] = (jnp.dot(h1.astype(jnp.bfloat16), Wf2_ref[...],
                              preferred_element_type=jnp.float32)
                      + bf2_ref[...])
    return kernel


# ---------------------------------------------------------------------------
# Wrapper
# ---------------------------------------------------------------------------
def cnn_mnist_forward(packed, x):
    """x: (N, 1, 28, 28) f32 -> logits (N, 10)."""
    n, c, h, w = x.shape
    assert (c, h, w) == (1, 28, 28), "CNNMnist requires (N, 1, 28, 28) input"
    nb = min(MAX_NB, _round_up(max(n, 1), 8))
    b_pad = _round_up(n, nb)
    nt = b_pad // nb

    # Wrapper-side im2col over the 5 conv1 kernel rows + row reordering so the
    # kernel's input block is a plain 2-D slab (rows = h_out*nb + n_local,
    # lanes = 32*ky + w_in), cast to bf16 (halves the input DMA).
    x2d = jnp.pad(x[:, 0].astype(jnp.bfloat16),
                  ((0, b_pad - n), (0, 0), (0, 0)))                # (b_pad,28,28)
    bands = jnp.stack([x2d[:, ky:ky + 24, :] for ky in range(5)], axis=2)
    bands = jnp.pad(bands, ((0, 0), (0, 0), (0, 0), (0, 4)))       # (b_pad,24,5,32)
    xt = (bands.reshape(nt, nb, 24, 160)
               .transpose(0, 2, 1, 3)
               .reshape(nt * 24 * nb, 160))

    out = pl.pallas_call(
        _make_kernel(nb),
        out_shape=jax.ShapeDtypeStruct((b_pad, 128), jnp.float32),
        grid=(nt,),
        in_specs=[
            pl.BlockSpec((24 * nb, 160), lambda i: (i, 0)),   # input im2col tile
            pl.BlockSpec((160, 256), lambda i: (0, 0)),       # conv1 bands
            pl.BlockSpec((1, 128), lambda i: (0, 0)),         # conv1 bias
            pl.BlockSpec((640, 256), lambda i: (0, 0)),       # conv2 bands
            pl.BlockSpec((1, 128), lambda i: (0, 0)),         # conv2 bias
            pl.BlockSpec((512, 128), lambda i: (0, 0)),       # fc1
            pl.BlockSpec((1, 128), lambda i: (0, 0)),         # fc1 bias
            pl.BlockSpec((128, 128), lambda i: (0, 0)),       # fc2
            pl.BlockSpec((1, 128), lambda i: (0, 0)),         # fc2 bias
        ],
        out_specs=pl.BlockSpec((nb, 128), lambda i: (i, 0)),
        scratch_shapes=[
            pltpu.VMEM((24 * nb, 256), jnp.float32),          # conv1 output
            pltpu.VMEM((8 * nb, 640), jnp.bfloat16),          # conv2 staging
            pltpu.VMEM((8 * nb, 256), jnp.float32),           # conv2 output
            pltpu.VMEM((nb, 512), jnp.bfloat16),              # fc1 staging
        ],
        compiler_params=pltpu.CompilerParams(
            dimension_semantics=("parallel",),
            vmem_limit_bytes=32 * 1024 * 1024),
    )(xt, packed["B1"], packed["b1"], packed["B2"], packed["b2"],
      packed["Wf1"], packed["bf1"], packed["Wf2"], packed["bf2"])
    return out[:n, :10]


# ---------------------------------------------------------------------------
# One-time weight packing (host side): banded conv matrices, bf16, 128 lanes.
# ---------------------------------------------------------------------------
def pack_params(params):
    w1 = np.asarray(params["w1"], np.float32)   # (10, 1, 5, 5)
    b1 = np.asarray(params["b1"], np.float32)   # (10,)
    w2 = np.asarray(params["w2"], np.float32)   # (20, 10, 5, 5)
    b2 = np.asarray(params["b2"], np.float32)   # (20,)
    fw1 = np.asarray(params["fw1"], np.float32)  # (50, 320)
    fb1 = np.asarray(params["fb1"], np.float32)
    fw2 = np.asarray(params["fw2"], np.float32)  # (10, 50)
    fb2 = np.asarray(params["fb2"], np.float32)

    # conv1 banded weights: rows = 32*ky + w_in, lanes = pw*128 + co*12 + j,
    # output column w_out = 2*j + pw.
    B1 = np.zeros((160, 256), np.float32)
    for ky in range(5):
        for co in range(10):
            for j in range(12):
                for pw in range(2):
                    w_out = 2 * j + pw
                    col = pw * 128 + co * 12 + j
                    B1[32 * ky + w_out:32 * ky + w_out + 5, col] = w1[co, 0, ky, :]
    b1p = np.zeros((1, 128), np.float32)
    for co in range(10):
        b1p[0, co * 12:(co + 1) * 12] = b1[co]

    # conv2 banded weights: rows = 128*ky + ci*12 + w_in,
    # lanes = pw*128 + co*4 + jj, output column w2_out = 2*jj + pw.
    B2 = np.zeros((640, 256), np.float32)
    for ky in range(5):
        for co in range(20):
            for ci in range(10):
                for jj in range(4):
                    for pw in range(2):
                        w_out = 2 * jj + pw
                        col = pw * 128 + co * 4 + jj
                        r0 = 128 * ky + ci * 12 + w_out
                        B2[r0:r0 + 5, col] = w2[co, ci, ky, :]
    b2p = np.zeros((1, 128), np.float32)
    for co in range(20):
        b2p[0, co * 4:(co + 1) * 4] = b2[co]

    # fc1 as one (512,128) matrix: rows = 128*i2 + co*4 + jj (matching the
    # fc1 staging layout); PyTorch flatten index = co*16 + i2*4 + jj.
    Wf1 = np.zeros((512, 128), np.float32)
    for i2 in range(4):
        for co in range(20):
            for jj in range(4):
                Wf1[128 * i2 + co * 4 + jj, :50] = fw1[:, co * 16 + i2 * 4 + jj]
    bf1 = np.zeros((1, 128), np.float32)
    bf1[0, :50] = fb1

    Wf2 = np.zeros((128, 128), np.float32)
    Wf2[:50, :10] = fw2.T
    bf2 = np.zeros((1, 128), np.float32)
    bf2[0, :10] = fb2

    return {
        "B1": jnp.asarray(B1, jnp.bfloat16),
        "b1": jnp.asarray(b1p, jnp.float32),
        "B2": jnp.asarray(B2, jnp.bfloat16),
        "b2": jnp.asarray(b2p, jnp.float32),
        "Wf1": jnp.asarray(Wf1, jnp.bfloat16),
        "bf1": jnp.asarray(bf1, jnp.float32),
        "Wf2": jnp.asarray(Wf2, jnp.bfloat16),
        "bf2": jnp.asarray(bf2, jnp.float32),
    }


# ---------------------------------------------------------------------------
# Pure-JAX reference (correctness check only) and parameter init
# ---------------------------------------------------------------------------
def reference_forward(params, x):
    def conv(x, w, b):
        y = jax.lax.conv_general_dilated(
            x, w, (1, 1), "VALID",
            dimension_numbers=("NCHW", "OIHW", "NCHW"),
            precision=jax.lax.Precision.HIGHEST)
        return y + b.reshape(1, -1, 1, 1)

    def pool_relu(x):
        y = jax.lax.reduce_window(x, -jnp.inf, jax.lax.max,
                                  (1, 1, 2, 2), (1, 1, 2, 2), "VALID")
        return jnp.maximum(y, 0.0)

    x = pool_relu(conv(x, params["w1"], params["b1"]))
    x = pool_relu(conv(x, params["w2"], params["b2"]))
    x = x.reshape(x.shape[0], -1)
    x = jnp.maximum(
        jnp.dot(x, params["fw1"].T, precision=jax.lax.Precision.HIGHEST)
        + params["fb1"], 0.0)
    return (jnp.dot(x, params["fw2"].T, precision=jax.lax.Precision.HIGHEST)
            + params["fb2"])


def init_params(key):
    def uniform(key, shape, fan_in):
        bound = 1.0 / jnp.sqrt(fan_in)
        return jax.random.uniform(key, shape, jnp.float32, -bound, bound)

    ks = jax.random.split(key, 8)
    return {
        "w1": uniform(ks[0], (10, 1, 5, 5), 1 * 5 * 5),
        "b1": uniform(ks[1], (10,), 1 * 5 * 5),
        "w2": uniform(ks[2], (20, 10, 5, 5), 10 * 5 * 5),
        "b2": uniform(ks[3], (20,), 10 * 5 * 5),
        "fw1": uniform(ks[4], (50, 320), 320),
        "fb1": uniform(ks[5], (50,), 320),
        "fw2": uniform(ks[6], (10, 50), 50),
        "fb2": uniform(ks[7], (10,), 50),
    }


if __name__ == "__main__":
    root = jax.random.PRNGKey(0)
    k_x, k_p = jax.random.split(root)

    params = init_params(k_p)
    packed = pack_params(params)        # one-time weight packing / padding
    fwd = jax.jit(cnn_mnist_forward)

    # MNIST-shaped input is required by the architecture (fc1 expects 20*4*4).
    # Small deterministic check (batch=2 -> small 8-sample tile path).
    batch = 2
    x = jax.random.normal(k_x, (batch, 1, 28, 28), jnp.float32)
    out = jax.block_until_ready(fwd(packed, x))
    ref = jax.block_until_ready(reference_forward(params, x))
    assert out.shape == (batch, 10), out.shape
    assert jnp.allclose(out, ref, atol=2e-2, rtol=2e-2), (
        f"max abs diff = {jnp.max(jnp.abs(out - ref))}")

    # Larger batch exercises the performance path (NB=128, 2 parallel tiles).
    xb = jax.random.normal(k_x, (256, 1, 28, 28), jnp.float32)
    outb = jax.block_until_ready(fwd(packed, xb))
    refb = jax.block_until_ready(reference_forward(params, xb))
    assert jnp.allclose(outb, refb, atol=2e-2, rtol=2e-2), (
        f"max abs diff = {jnp.max(jnp.abs(outb - refb))}")

    print("KERNEL_OK")
</pallas_src>

<mosaic_0001>
module attributes {stable_mosaic.version = 11 : i64} {
  func.func @kernel(%arg0: i32, %arg1: memref<192x160xbf16, #tpu.memory_space<vmem>>, %arg2: memref<160x256xbf16, #tpu.memory_space<vmem>>, %arg3: memref<1x128xf32, #tpu.memory_space<vmem>>, %arg4: memref<640x256xbf16, #tpu.memory_space<vmem>>, %arg5: memref<1x128xf32, #tpu.memory_space<vmem>>, %arg6: memref<512x128xbf16, #tpu.memory_space<vmem>>, %arg7: memref<1x128xf32, #tpu.memory_space<vmem>>, %arg8: memref<128x128xbf16, #tpu.memory_space<vmem>>, %arg9: memref<1x128xf32, #tpu.memory_space<vmem>>, %arg10: memref<8x128xf32, #tpu.memory_space<vmem>>, %arg11: memref<192x256xf32, #tpu.memory_space<vmem>>, %arg12: memref<64x640xbf16, #tpu.memory_space<vmem>>, %arg13: memref<64x256xf32, #tpu.memory_space<vmem>>, %arg14: memref<8x512xbf16, #tpu.memory_space<vmem>>) attributes {dimension_semantics = [#tpu.dimension_semantics<parallel>], iteration_bounds = array<i64: 1>, scalar_prefetch = 0 : i64, scratch_operands = 4 : i64, tpu.core_type = #tpu.core_type<tc>, window_params = [{transform_indices = @transform_0, window_bounds = array<i64: 192, 160>}, {pipeline_mode = #tpu.pipeline_mode<synchronous>, transform_indices = @transform_1, window_bounds = array<i64: 160, 256>}, {pipeline_mode = #tpu.pipeline_mode<synchronous>, transform_indices = @transform_2, window_bounds = array<i64: 1, 128>}, {pipeline_mode = #tpu.pipeline_mode<synchronous>, transform_indices = @transform_3, window_bounds = array<i64: 640, 256>}, {pipeline_mode = #tpu.pipeline_mode<synchronous>, transform_indices = @transform_4, window_bounds = array<i64: 1, 128>}, {pipeline_mode = #tpu.pipeline_mode<synchronous>, transform_indices = @transform_5, window_bounds = array<i64: 512, 128>}, {pipeline_mode = #tpu.pipeline_mode<synchronous>, transform_indices = @transform_6, window_bounds = array<i64: 1, 128>}, {pipeline_mode = #tpu.pipeline_mode<synchronous>, transform_indices = @transform_7, window_bounds = array<i64: 128, 128>}, {pipeline_mode = #tpu.pipeline_mode<synchronous>, transform_indices = @transform_8, window_bounds = array<i64: 1, 128>}, {transform_indices = @transform_9, window_bounds = array<i64: 8, 128>}]} {
    %c0 = arith.constant 0 : index
    %c0_0 = arith.constant 0 : index
    %0 = vector.load %arg1[%c0, %c0_0] : memref<192x160xbf16, #tpu.memory_space<vmem>>, vector<192x160xbf16>
    %c0_1 = arith.constant 0 : index
    %c0_2 = arith.constant 0 : index
    %1 = vector.load %arg2[%c0_1, %c0_2] : memref<160x256xbf16, #tpu.memory_space<vmem>>, vector<160x256xbf16>
    %cst = arith.constant dense<0.000000e+00> : vector<192x256xf32>
    %2 = tpu.matmul %0, %1, %cst {dimension_numbers = #tpu.dot_dimension_numbers<[1], [0], [0], [1], [0, 0, 1, 1], [], []>} : vector<192x160xbf16>, vector<160x256xbf16>, vector<192x256xf32> -> vector<192x256xf32>
    %c0_3 = arith.constant 0 : index
    %c0_4 = arith.constant 0 : index
    %3 = vector.load %arg11[%c0_3, %c0_4] : memref<192x256xf32, #tpu.memory_space<vmem>>, vector<192x256xf32>
    tpu.vector_store %arg11[%c0_3, %c0_4], %2 {strides = array<i32>} : memref<192x256xf32, #tpu.memory_space<vmem>>, vector<192x256xf32>,
    %c0_5 = arith.constant 0 : index
    %c0_6 = arith.constant 0 : index
    %4 = vector.load %arg3[%c0_5, %c0_6] : memref<1x128xf32, #tpu.memory_space<vmem>>, vector<1x128xf32>
    %5 = vector.shape_cast %4 : vector<1x128xf32> to vector<1x128xf32>
    %6 = vector.broadcast %5 : vector<1x128xf32> to vector<8x128xf32>
    %c0_7 = arith.constant 0 : index
    %c0_8 = arith.constant 0 : index
    %7 = vector.load %arg11[%c0_7, %c0_8] : memref<192x256xf32, #tpu.memory_space<vmem>>, vector<8x256xf32>
    %c8 = arith.constant 8 : index
    %c0_9 = arith.constant 0 : index
    %8 = vector.load %arg11[%c8, %c0_9] : memref<192x256xf32, #tpu.memory_space<vmem>>, vector<8x256xf32>
    %9 = vector.extract_strided_slice %7 {offsets = [0, 0], sizes = [8, 128], strides = [1, 1]} : vector<8x256xf32> to vector<8x128xf32>
    %10 = vector.extract_strided_slice %7 {offsets = [0, 128], sizes = [8, 128], strides = [1, 1]} : vector<8x256xf32> to vector<8x128xf32>
    %11 = arith.maximumf %9, %10 : vector<8x128xf32>
    %12 = vector.extract_strided_slice %8 {offsets = [0, 0], sizes = [8, 128], strides = [1, 1]} : vector<8x256xf32> to vector<8x128xf32>
    %13 = vector.extract_strided_slice %8 {offsets = [0, 128], sizes = [8, 128], strides = [1, 1]} : vector<8x256xf32> to vector<8x128xf32>
    %14 = arith.maximumf %12, %13 : vector<8x128xf32>
    %15 = arith.maximumf %11, %14 : vector<8x128xf32>
    %16 = arith.addf %15, %6 : vector<8x128xf32>
    %cst_10 = arith.constant 0.000000e+00 : f32
    %17 = vector.broadcast %cst_10 : f32 to vector<8x128xf32>
    %18 = arith.maximumf %16, %17 : vector<8x128xf32>
    %19 = arith.truncf %18 : vector<8x128xf32> to vector<8x128xbf16>
    %c0_11 = arith.constant 0 : index
    %c0_12 = arith.constant 0 : index
    %20 = vector.load %arg12[%c0_11, %c0_12] : memref<64x640xbf16, #tpu.memory_space<vmem>>, vector<8x128xbf16>
    tpu.vector_store %arg12[%c0_11, %c0_12], %19 {strides = array<i32>} : memref<64x640xbf16, #tpu.memory_space<vmem>>, vector<8x128xbf16>,
    %c16 = arith.constant 16 : index
    %c0_13 = arith.constant 0 : index
    %21 = vector.load %arg11[%c16, %c0_13] : memref<192x256xf32, #tpu.memory_space<vmem>>, vector<8x256xf32>
    %c24 = arith.constant 24 : index
    %c0_14 = arith.constant 0 : index
    %22 = vector.load %arg11[%c24, %c0_14] : memref<192x256xf32, #tpu.memory_space<vmem>>, vector<8x256xf32>
    %23 = vector.extract_strided_slice %21 {offsets = [0, 0], sizes = [8, 128], strides = [1, 1]} : vector<8x256xf32> to vector<8x128xf32>
    %24 = vector.extract_strided_slice %21 {offsets = [0, 128], sizes = [8, 128], strides = [1, 1]} : vector<8x256xf32> to vector<8x128xf32>
    %25 = arith.maximumf %23, %24 : vector<8x128xf32>
    %26 = vector.extract_strided_slice %22 {offsets = [0, 0], sizes = [8, 128], strides = [1, 1]} : vector<8x256xf32> to vector<8x128xf32>
    %27 = vector.extract_strided_slice %22 {offsets = [0, 128], sizes = [8, 128], strides = [1, 1]} : vector<8x256xf32> to vector<8x128xf32>
    %28 = arith.maximumf %26, %27 : vector<8x128xf32>
    %29 = arith.maximumf %25, %28 : vector<8x128xf32>
    %30 = arith.addf %29, %6 : vector<8x128xf32>
    %cst_15 = arith.constant 0.000000e+00 : f32
    %31 = vector.broadcast %cst_15 : f32 to vector<8x128xf32>
    %32 = arith.maximumf %30, %31 : vector<8x128xf32>
    %33 = arith.truncf %32 : vector<8x128xf32> to vector<8x128xbf16>
    %c8_16 = arith.constant 8 : index
    %c0_17 = arith.constant 0 : index
    %34 = vector.load %arg12[%c8_16, %c0_17] : memref<64x640xbf16, #tpu.memory_space<vmem>>, vector<8x128xbf16>
    tpu.vector_store %arg12[%c8_16, %c0_17], %33 {strides = array<i32>} : memref<64x640xbf16, #tpu.memory_space<vmem>>, vector<8x128xbf16>,
    %c0_18 = arith.constant 0 : index
    %c128 = arith.constant 128 : index
    %35 = vector.load %arg12[%c0_18, %c128] : memref<64x640xbf16, #tpu.memory_space<vmem>>, vector<8x128xbf16>
    tpu.vector_store %arg12[%c0_18, %c128], %33 {strides = array<i32>} : memref<64x640xbf16, #tpu.memory_space<vmem>>, vector<8x128xbf16>,
    %c32 = arith.constant 32 : index
    %c0_19 = arith.constant 0 : index
    %36 = vector.load %arg11[%c32, %c0_19] : memref<192x256xf32, #tpu.memory_space<vmem>>, vector<8x256xf32>
    %c40 = arith.constant 40 : index
    %c0_20 = arith.constant 0 : index
    %37 = vector.load %arg11[%c40, %c0_20] : memref<192x256xf32, #tpu.memory_space<vmem>>, vector<8x256xf32>
    %38 = vector.extract_strided_slice %36 {offsets = [0, 0], sizes = [8, 128], strides = [1, 1]} : vector<8x256xf32> to vector<8x128xf32>
    %39 = vector.extract_strided_slice %36 {offsets = [0, 128], sizes = [8, 128], strides = [1, 1]} : vector<8x256xf32> to vector<8x128xf32>
    %40 = arith.maximumf %38, %39 : vector<8x128xf32>
    %41 = vector.extract_strided_slice %37 {offsets = [0, 0], sizes = [8, 128], strides = [1, 1]} : vector<8x256xf32> to vector<8x128xf32>
    %42 = vector.extract_strided_slice %37 {offsets = [0, 128], sizes = [8, 128], strides = [1, 1]} : vector<8x256xf32> to vector<8x128xf32>
    %43 = arith.maximumf %41, %42 : vector<8x128xf32>
    %44 = arith.maximumf %40, %43 : vector<8x128xf32>
    %45 = arith.addf %44, %6 : vector<8x128xf32>
    %cst_21 = arith.constant 0.000000e+00 : f32
    %46 = vector.broadcast %cst_21 : f32 to vector<8x128xf32>
    %47 = arith.maximumf %45, %46 : vector<8x128xf32>
    %48 = arith.truncf %47 : vector<8x128xf32> to vector<8x128xbf16>
    %c16_22 = arith.constant 16 : index
    %c0_23 = arith.constant 0 : index
    %49 = vector.load %arg12[%c16_22, %c0_23] : memref<64x640xbf16, #tpu.memory_space<vmem>>, vector<8x128xbf16>
    tpu.vector_store %arg12[%c16_22, %c0_23], %48 {strides = array<i32>} : memref<64x640xbf16, #tpu.memory_space<vmem>>, vector<8x128xbf16>,
    %c8_24 = arith.constant 8 : index
    %c128_25 = arith.constant 128 : index
    %50 = vector.load %arg12[%c8_24, %c128_25] : memref<64x640xbf16, #tpu.memory_space<vmem>>, vector<8x128xbf16>
    tpu.vector_store %arg12[%c8_24, %c128_25], %48 {strides = array<i32>} : memref<64x640xbf16, #tpu.memory_space<vmem>>, vector<8x128xbf16>,
    %c0_26 = arith.constant 0 : index
    %c256 = arith.constant 256 : index
    %51 = vector.load %arg12[%c0_26, %c256] : memref<64x640xbf16, #tpu.memory_space<vmem>>, vector<8x128xbf16>
    tpu.vector_store %arg12[%c0_26, %c256], %48 {strides = array<i32>} : memref<64x640xbf16, #tpu.memory_space<vmem>>, vector<8x128xbf16>,
    %c48 = arith.constant 48 : index
    %c0_27 = arith.constant 0 : index
    %52 = vector.load %arg11[%c48, %c0_27] : memref<192x256xf32, #tpu.memory_space<vmem>>, vector<8x256xf32>
    %c56 = arith.constant 56 : index
    %c0_28 = arith.constant 0 : index
    %53 = vector.load %arg11[%c56, %c0_28] : memref<192x256xf32, #tpu.memory_space<vmem>>, vector<8x256xf32>
    %54 = vector.extract_strided_slice %52 {offsets = [0, 0], sizes = [8, 128], strides = [1, 1]} : vector<8x256xf32> to vector<8x128xf32>
    %55 = vector.extract_strided_slice %52 {offsets = [0, 128], sizes = [8, 128], strides = [1, 1]} : vector<8x256xf32> to vector<8x128xf32>
    %56 = arith.maximumf %54, %55 : vector<8x128xf32>
    %57 = vector.extract_strided_slice %53 {offsets = [0, 0], sizes = [8, 128], strides = [1, 1]} : vector<8x256xf32> to vector<8x128xf32>
    %58 = vector.extract_strided_slice %53 {offsets = [0, 128], sizes = [8, 128], strides = [1, 1]} : vector<8x256xf32> to vector<8x128xf32>
    %59 = arith.maximumf %57, %58 : vector<8x128xf32>
    %60 = arith.maximumf %56, %59 : vector<8x128xf32>
    %61 = arith.addf %60, %6 : vector<8x128xf32>
    %cst_29 = arith.constant 0.000000e+00 : f32
    %62 = vector.broadcast %cst_29 : f32 to vector<8x128xf32>
    %63 = arith.maximumf %61, %62 : vector<8x128xf32>
    %64 = arith.truncf %63 : vector<8x128xf32> to vector<8x128xbf16>
    %c24_30 = arith.constant 24 : index
    %c0_31 = arith.constant 0 : index
    %65 = vector.load %arg12[%c24_30, %c0_31] : memref<64x640xbf16, #tpu.memory_space<vmem>>, vector<8x128xbf16>
    tpu.vector_store %arg12[%c24_30, %c0_31], %64 {strides = array<i32>} : memref<64x640xbf16, #tpu.memory_space<vmem>>, vector<8x128xbf16>,
    %c16_32 = arith.constant 16 : index
    %c128_33 = arith.constant 128 : index
    %66 = vector.load %arg12[%c16_32, %c128_33] : memref<64x640xbf16, #tpu.memory_space<vmem>>, vector<8x128xbf16>
    tpu.vector_store %arg12[%c16_32, %c128_33], %64 {strides = array<i32>} : memref<64x640xbf16, #tpu.memory_space<vmem>>, vector<8x128xbf16>,
    %c8_34 = arith.constant 8 : index
    %c256_35 = arith.constant 256 : index
    %67 = vector.load %arg12[%c8_34, %c256_35] : memref<64x640xbf16, #tpu.memory_space<vmem>>, vector<8x128xbf16>
    tpu.vector_store %arg12[%c8_34, %c256_35], %64 {strides = array<i32>} : memref<64x640xbf16, #tpu.memory_space<vmem>>, vector<8x128xbf16>,
    %c0_36 = arith.constant 0 : index
    %c384 = arith.constant 384 : index
    %68 = vector.load %arg12[%c0_36, %c384] : memref<64x640xbf16, #tpu.memory_space<vmem>>, vector<8x128xbf16>
    tpu.vector_store %arg12[%c0_36, %c384], %64 {strides = array<i32>} : memref<64x640xbf16, #tpu.memory_space<vmem>>, vector<8x128xbf16>,
    %c64 = arith.constant 64 : index
    %c0_37 = arith.constant 0 : index
    %69 = vector.load %arg11[%c64, %c0_37] : memref<192x256xf32, #tpu.memory_space<vmem>>, vector<8x256xf32>
    %c72 = arith.constant 72 : index
    %c0_38 = arith.constant 0 : index
    %70 = vector.load %arg11[%c72, %c0_38] : memref<192x256xf32, #tpu.memory_space<vmem>>, vector<8x256xf32>
    %71 = vector.extract_strided_slice %69 {offsets = [0, 0], sizes = [8, 128], strides = [1, 1]} : vector<8x256xf32> to vector<8x128xf32>
    %72 = vector.extract_strided_slice %69 {offsets = [0, 128], sizes = [8, 128], strides = [1, 1]} : vector<8x256xf32> to vector<8x128xf32>
    %73 = arith.maximumf %71, %72 : vector<8x128xf32>
    %74 = vector.extract_strided_slice %70 {offsets = [0, 0], sizes = [8, 128], strides = [1, 1]} : vector<8x256xf32> to vector<8x128xf32>
    %75 = vector.extract_strided_slice %70 {offsets = [0, 128], sizes = [8, 128], strides = [1, 1]} : vector<8x256xf32> to vector<8x128xf32>
    %76 = arith.maximumf %74, %75 : vector<8x128xf32>
    %77 = arith.maximumf %73, %76 : vector<8x128xf32>
    %78 = arith.addf %77, %6 : vector<8x128xf32>
    %cst_39 = arith.constant 0.000000e+00 : f32
    %79 = vector.broadcast %cst_39 : f32 to vector<8x128xf32>
    %80 = arith.maximumf %78, %79 : vector<8x128xf32>
    %81 = arith.truncf %80 : vector<8x128xf32> to vector<8x128xbf16>
    %c32_40 = arith.constant 32 : index
    %c0_41 = arith.constant 0 : index
    %82 = vector.load %arg12[%c32_40, %c0_41] : memref<64x640xbf16, #tpu.memory_space<vmem>>, vector<8x128xbf16>
    tpu.vector_store %arg12[%c32_40, %c0_41], %81 {strides = array<i32>} : memref<64x640xbf16, #tpu.memory_space<vmem>>, vector<8x128xbf16>,
    %c24_42 = arith.constant 24 : index
    %c128_43 = arith.constant 128 : index
    %83 = vector.load %arg12[%c24_42, %c128_43] : memref<64x640xbf16, #tpu.memory_space<vmem>>, vector<8x128xbf16>
    tpu.vector_store %arg12[%c24_42, %c128_43], %81 {strides = array<i32>} : memref<64x640xbf16, #tpu.memory_space<vmem>>, vector<8x128xbf16>,
    %c16_44 = arith.constant 16 : index
    %c256_45 = arith.constant 256 : index
    %84 = vector.load %arg12[%c16_44, %c256_45] : memref<64x640xbf16, #tpu.memory_space<vmem>>, vector<8x128xbf16>
    tpu.vector_store %arg12[%c16_44, %c256_45], %81 {strides = array<i32>} : memref<64x640xbf16, #tpu.memory_space<vmem>>, vector<8x128xbf16>,
    %c8_46 = arith.constant 8 : index
    %c384_47 = arith.constant 384 : index
    %85 = vector.load %arg12[%c8_46, %c384_47] : memref<64x640xbf16, #tpu.memory_space<vmem>>, vector<8x128xbf16>
    tpu.vector_store %arg12[%c8_46, %c384_47], %81 {strides = array<i32>} : memref<64x640xbf16, #tpu.memory_space<vmem>>, vector<8x128xbf16>,
    %c0_48 = arith.constant 0 : index
    %c512 = arith.constant 512 : index
    %86 = vector.load %arg12[%c0_48, %c512] : memref<64x640xbf16, #tpu.memory_space<vmem>>, vector<8x128xbf16>
    tpu.vector_store %arg12[%c0_48, %c512], %81 {strides = array<i32>} : memref<64x640xbf16, #tpu.memory_space<vmem>>, vector<8x128xbf16>,
    %c80 = arith.constant 80 : index
    %c0_49 = arith.constant 0 : index
    %87 = vector.load %arg11[%c80, %c0_49] : memref<192x256xf32, #tpu.memory_space<vmem>>, vector<8x256xf32>
    %c88 = arith.constant 88 : index
    %c0_50 = arith.constant 0 : index
    %88 = vector.load %arg11[%c88, %c0_50] : memref<192x256xf32, #tpu.memory_space<vmem>>, vector<8x256xf32>
    %89 = vector.extract_strided_slice %87 {offsets = [0, 0], sizes = [8, 128], strides = [1, 1]} : vector<8x256xf32> to vector<8x128xf32>
    %90 = vector.extract_strided_slice %87 {offsets = [0, 128], sizes = [8, 128], strides = [1, 1]} : vector<8x256xf32> to vector<8x128xf32>
    %91 = arith.maximumf %89, %90 : vector<8x128xf32>
    %92 = vector.extract_strided_slice %88 {offsets = [0, 0], sizes = [8, 128], strides = [1, 1]} : vector<8x256xf32> to vector<8x128xf32>
    %93 = vector.extract_strided_slice %88 {offsets = [0, 128], sizes = [8, 128], strides = [1, 1]} : vector<8x256xf32> to vector<8x128xf32>
    %94 = arith.maximumf %92, %93 : vector<8x128xf32>
    %95 = arith.maximumf %91, %94 : vector<8x128xf32>
    %96 = arith.addf %95, %6 : vector<8x128xf32>
    %cst_51 = arith.constant 0.000000e+00 : f32
    %97 = vector.broadcast %cst_51 : f32 to vector<8x128xf32>
    %98 = arith.maximumf %96, %97 : vector<8x128xf32>
    %99 = arith.truncf %98 : vector<8x128xf32> to vector<8x128xbf16>
    %c40_52 = arith.constant 40 : index
    %c0_53 = arith.constant 0 : index
    %100 = vector.load %arg12[%c40_52, %c0_53] : memref<64x640xbf16, #tpu.memory_space<vmem>>, vector<8x128xbf16>
    tpu.vector_store %arg12[%c40_52, %c0_53], %99 {strides = array<i32>} : memref<64x640xbf16, #tpu.memory_space<vmem>>, vector<8x128xbf16>,
    %c32_54 = arith.constant 32 : index
    %c128_55 = arith.constant 128 : index
    %101 = vector.load %arg12[%c32_54, %c128_55] : memref<64x640xbf16, #tpu.memory_space<vmem>>, vector<8x128xbf16>
    tpu.vector_store %arg12[%c32_54, %c128_55], %99 {strides = array<i32>} : memref<64x640xbf16, #tpu.memory_space<vmem>>, vector<8x128xbf16>,
    %c24_56 = arith.constant 24 : index
    %c256_57 = arith.constant 256 : index
    %102 = vector.load %arg12[%c24_56, %c256_57] : memref<64x640xbf16, #tpu.memory_space<vmem>>, vector<8x128xbf16>
    tpu.vector_store %arg12[%c24_56, %c256_57], %99 {strides = array<i32>} : memref<64x640xbf16, #tpu.memory_space<vmem>>, vector<8x128xbf16>,
    %c16_58 = arith.constant 16 : index
    %c384_59 = arith.constant 384 : index
    %103 = vector.load %arg12[%c16_58, %c384_59] : memref<64x640xbf16, #tpu.memory_space<vmem>>, vector<8x128xbf16>
    tpu.vector_store %arg12[%c16_58, %c384_59], %99 {strides = array<i32>} : memref<64x640xbf16, #tpu.memory_space<vmem>>, vector<8x128xbf16>,
    %c8_60 = arith.constant 8 : index
    %c512_61 = arith.constant 512 : index
    %104 = vector.load %arg12[%c8_60, %c512_61] : memref<64x640xbf16, #tpu.memory_space<vmem>>, vector<8x128xbf16>
    tpu.vector_store %arg12[%c8_60, %c512_61], %99 {strides = array<i32>} : memref<64x640xbf16, #tpu.memory_space<vmem>>, vector<8x128xbf16>,
    %c96 = arith.constant 96 : index
    %c0_62 = arith.constant 0 : index
    %105 = vector.load %arg11[%c96, %c0_62] : memref<192x256xf32, #tpu.memory_space<vmem>>, vector<8x256xf32>
    %c104 = arith.constant 104 : index
    %c0_63 = arith.constant 0 : index
    %106 = vector.load %arg11[%c104, %c0_63] : memref<192x256xf32, #tpu.memory_space<vmem>>, vector<8x256xf32>
    %107 = vector.extract_strided_slice %105 {offsets = [0, 0], sizes = [8, 128], strides = [1, 1]} : vector<8x256xf32> to vector<8x128xf32>
    %108 = vector.extract_strided_slice %105 {offsets = [0, 128], sizes = [8, 128], strides = [1, 1]} : vector<8x256xf32> to vector<8x128xf32>
    %109 = arith.maximumf %107, %108 : vector<8x128xf32>
    %110 = vector.extract_strided_slice %106 {offsets = [0, 0], sizes = [8, 128], strides = [1, 1]} : vector<8x256xf32> to vector<8x128xf32>
    %111 = vector.extract_strided_slice %106 {offsets = [0, 128], sizes = [8, 128], strides = [1, 1]} : vector<8x256xf32> to vector<8x128xf32>
    %112 = arith.maximumf %110, %111 : vector<8x128xf32>
    %113 = arith.maximumf %109, %112 : vector<8x128xf32>
    %114 = arith.addf %113, %6 : vector<8x128xf32>
    %cst_64 = arith.constant 0.000000e+00 : f32
    %115 = vector.broadcast %cst_64 : f32 to vector<8x128xf32>
    %116 = arith.maximumf %114, %115 : vector<8x128xf32>
    %117 = arith.truncf %116 : vector<8x128xf32> to vector<8x128xbf16>
    %c48_65 = arith.constant 48 : index
    %c0_66 = arith.constant 0 : index
    %118 = vector.load %arg12[%c48_65, %c0_66] : memref<64x640xbf16, #tpu.memory_space<vmem>>, vector<8x128xbf16>
    tpu.vector_store %arg12[%c48_65, %c0_66], %117 {strides = array<i32>} : memref<64x640xbf16, #tpu.memory_space<vmem>>, vector<8x128xbf16>,
    %c40_67 = arith.constant 40 : index
    %c128_68 = arith.constant 128 : index
    %119 = vector.load %arg12[%c40_67, %c128_68] : memref<64x640xbf16, #tpu.memory_space<vmem>>, vector<8x128xbf16>
    tpu.vector_store %arg12[%c40_67, %c128_68], %117 {strides = array<i32>} : memref<64x640xbf16, #tpu.memory_space<vmem>>, vector<8x128xbf16>,
    %c32_69 = arith.constant 32 : index
    %c256_70 = arith.constant 256 : index
    %120 = vector.load %arg12[%c32_69, %c256_70] : memref<64x640xbf16, #tpu.memory_space<vmem>>, vector<8x128xbf16>
    tpu.vector_store %arg12[%c32_69, %c256_70], %117 {strides = array<i32>} : memref<64x640xbf16, #tpu.memory_space<vmem>>, vector<8x128xbf16>,
    %c24_71 = arith.constant 24 : index
    %c384_72 = arith.constant 384 : index
    %121 = vector.load %arg12[%c24_71, %c384_72] : memref<64x640xbf16, #tpu.memory_space<vmem>>, vector<8x128xbf16>
    tpu.vector_store %arg12[%c24_71, %c384_72], %117 {strides = array<i32>} : memref<64x640xbf16, #tpu.memory_space<vmem>>, vector<8x128xbf16>,
    %c16_73 = arith.constant 16 : index
    %c512_74 = arith.constant 512 : index
    %122 = vector.load %arg12[%c16_73, %c512_74] : memref<64x640xbf16, #tpu.memory_space<vmem>>, vector<8x128xbf16>
    tpu.vector_store %arg12[%c16_73, %c512_74], %117 {strides = array<i32>} : memref<64x640xbf16, #tpu.memory_space<vmem>>, vector<8x128xbf16>,
    %c112 = arith.constant 112 : index
    %c0_75 = arith.constant 0 : index
    %123 = vector.load %arg11[%c112, %c0_75] : memref<192x256xf32, #tpu.memory_space<vmem>>, vector<8x256xf32>
    %c120 = arith.constant 120 : index
    %c0_76 = arith.constant 0 : index
    %124 = vector.load %arg11[%c120, %c0_76] : memref<192x256xf32, #tpu.memory_space<vmem>>, vector<8x256xf32>
    %125 = vector.extract_strided_slice %123 {offsets = [0, 0], sizes = [8, 128], strides = [1, 1]} : vector<8x256xf32> to vector<8x128xf32>
    %126 = vector.extract_strided_slice %123 {offsets = [0, 128], sizes = [8, 128], strides = [1, 1]} : vector<8x256xf32> to vector<8x128xf32>
    %127 = arith.maximumf %125, %126 : vector<8x128xf32>
    %128 = vector.extract_strided_slice %124 {offsets = [0, 0], sizes = [8, 128], strides = [1, 1]} : vector<8x256xf32> to vector<8x128xf32>
    %129 = vector.extract_strided_slice %124 {offsets = [0, 128], sizes = [8, 128], strides = [1, 1]} : vector<8x256xf32> to vector<8x128xf32>
    %130 = arith.maximumf %128, %129 : vector<8x128xf32>
    %131 = arith.maximumf %127, %130 : vector<8x128xf32>
    %132 = arith.addf %131, %6 : vector<8x128xf32>
    %cst_77 = arith.constant 0.000000e+00 : f32
    %133 = vector.broadcast %cst_77 : f32 to vector<8x128xf32>
    %134 = arith.maximumf %132, %133 : vector<8x128xf32>
    %135 = arith.truncf %134 : vector<8x128xf32> to vector<8x128xbf16>
    %c56_78 = arith.constant 56 : index
    %c0_79 = arith.constant 0 : index
    %136 = vector.load %arg12[%c56_78, %c0_79] : memref<64x640xbf16, #tpu.memory_space<vmem>>, vector<8x128xbf16>
    tpu.vector_store %arg12[%c56_78, %c0_79], %135 {strides = array<i32>} : memref<64x640xbf16, #tpu.memory_space<vmem>>, vector<8x128xbf16>,
    %c48_80 = arith.constant 48 : index
    %c128_81 = arith.constant 128 : index
    %137 = vector.load %arg12[%c48_80, %c128_81] : memref<64x640xbf16, #tpu.memory_space<vmem>>, vector<8x128xbf16>
    tpu.vector_store %arg12[%c48_80, %c128_81], %135 {strides = array<i32>} : memref<64x640xbf16, #tpu.memory_space<vmem>>, vector<8x128xbf16>,
    %c40_82 = arith.constant 40 : index
    %c256_83 = arith.constant 256 : index
    %138 = vector.load %arg12[%c40_82, %c256_83] : memref<64x640xbf16, #tpu.memory_space<vmem>>, vector<8x128xbf16>
    tpu.vector_store %arg12[%c40_82, %c256_83], %135 {strides = array<i32>} : memref<64x640xbf16, #tpu.memory_space<vmem>>, vector<8x128xbf16>,
    %c32_84 = arith.constant 32 : index
    %c384_85 = arith.constant 384 : index
    %139 = vector.load %arg12[%c32_84, %c384_85] : memref<64x640xbf16, #tpu.memory_space<vmem>>, vector<8x128xbf16>
    tpu.vector_store %arg12[%c32_84, %c384_85], %135 {strides = array<i32>} : memref<64x640xbf16, #tpu.memory_space<vmem>>, vector<8x128xbf16>,
    %c24_86 = arith.constant 24 : index
    %c512_87 = arith.constant 512 : index
    %140 = vector.load %arg12[%c24_86, %c512_87] : memref<64x640xbf16, #tpu.memory_space<vmem>>, vector<8x128xbf16>
    tpu.vector_store %arg12[%c24_86, %c512_87], %135 {strides = array<i32>} : memref<64x640xbf16, #tpu.memory_space<vmem>>, vector<8x128xbf16>,
    %c128_88 = arith.constant 128 : index
    %c0_89 = arith.constant 0 : index
    %141 = vector.load %arg11[%c128_88, %c0_89] : memref<192x256xf32, #tpu.memory_space<vmem>>, vector<8x256xf32>
    %c136 = arith.constant 136 : index
    %c0_90 = arith.constant 0 : index
    %142 = vector.load %arg11[%c136, %c0_90] : memref<192x256xf32, #tpu.memory_space<vmem>>, vector<8x256xf32>
    %143 = vector.extract_strided_slice %141 {offsets = [0, 0], sizes = [8, 128], strides = [1, 1]} : vector<8x256xf32> to vector<8x128xf32>
    %144 = vector.extract_strided_slice %141 {offsets = [0, 128], sizes = [8, 128], strides = [1, 1]} : vector<8x256xf32> to vector<8x128xf32>
    %145 = arith.maximumf %143, %144 : vector<8x128xf32>
    %146 = vector.extract_strided_slice %142 {offsets = [0, 0], sizes = [8, 128], strides = [1, 1]} : vector<8x256xf32> to vector<8x128xf32>
    %147 = vector.extract_strided_slice %142 {offsets = [0, 128], sizes = [8, 128], strides = [1, 1]} : vector<8x256xf32> to vector<8x128xf32>
    %148 = arith.maximumf %146, %147 : vector<8x128xf32>
    %149 = arith.maximumf %145, %148 : vector<8x128xf32>
    %150 = arith.addf %149, %6 : vector<8x128xf32>
    %cst_91 = arith.constant 0.000000e+00 : f32
    %151 = vector.broadcast %cst_91 : f32 to vector<8x128xf32>
    %152 = arith.maximumf %150, %151 : vector<8x128xf32>
    %153 = arith.truncf %152 : vector<8x128xf32> to vector<8x128xbf16>
    %c56_92 = arith.constant 56 : index
    %c128_93 = arith.constant 128 : index
    %154 = vector.load %arg12[%c56_92, %c128_93] : memref<64x640xbf16, #tpu.memory_space<vmem>>, vector<8x128xbf16>
    tpu.vector_store %arg12[%c56_92, %c128_93], %153 {strides = array<i32>} : memref<64x640xbf16, #tpu.memory_space<vmem>>, vector<8x128xbf16>,
    %c48_94 = arith.constant 48 : index
    %c256_95 = arith.constant 256 : index
    %155 = vector.load %arg12[%c48_94, %c256_95] : memref<64x640xbf16, #tpu.memory_space<vmem>>, vector<8x128xbf16>
    tpu.vector_store %arg12[%c48_94, %c256_95], %153 {strides = array<i32>} : memref<64x640xbf16, #tpu.memory_space<vmem>>, vector<8x128xbf16>,
    %c40_96 = arith.constant 40 : index
    %c384_97 = arith.constant 384 : index
    %156 = vector.load %arg12[%c40_96, %c384_97] : memref<64x640xbf16, #tpu.memory_space<vmem>>, vector<8x128xbf16>
    tpu.vector_store %arg12[%c40_96, %c384_97], %153 {strides = array<i32>} : memref<64x640xbf16, #tpu.memory_space<vmem>>, vector<8x128xbf16>,
    %c32_98 = arith.constant 32 : index
    %c512_99 = arith.constant 512 : index
    %157 = vector.load %arg12[%c32_98, %c512_99] : memref<64x640xbf16, #tpu.memory_space<vmem>>, vector<8x128xbf16>
    tpu.vector_store %arg12[%c32_98, %c512_99], %153 {strides = array<i32>} : memref<64x640xbf16, #tpu.memory_space<vmem>>, vector<8x128xbf16>,
    %c144 = arith.constant 144 : index
    %c0_100 = arith.constant 0 : index
    %158 = vector.load %arg11[%c144, %c0_100] : memref<192x256xf32, #tpu.memory_space<vmem>>, vector<8x256xf32>
    %c152 = arith.constant 152 : index
    %c0_101 = arith.constant 0 : index
    %159 = vector.load %arg11[%c152, %c0_101] : memref<192x256xf32, #tpu.memory_space<vmem>>, vector<8x256xf32>
    %160 = vector.extract_strided_slice %158 {offsets = [0, 0], sizes = [8, 128], strides = [1, 1]} : vector<8x256xf32> to vector<8x128xf32>
    %161 = vector.extract_strided_slice %158 {offsets = [0, 128], sizes = [8, 128], strides = [1, 1]} : vector<8x256xf32> to vector<8x128xf32>
    %162 = arith.maximumf %160, %161 : vector<8x128xf32>
    %163 = vector.extract_strided_slice %159 {offsets = [0, 0], sizes = [8, 128], strides = [1, 1]} : vector<8x256xf32> to vector<8x128xf32>
    %164 = vector.extract_strided_slice %159 {offsets = [0, 128], sizes = [8, 128], strides = [1, 1]} : vector<8x256xf32> to vector<8x128xf32>
    %165 = arith.maximumf %163, %164 : vector<8x128xf32>
    %166 = arith.maximumf %162, %165 : vector<8x128xf32>
    %167 = arith.addf %166, %6 : vector<8x128xf32>
    %cst_102 = arith.constant 0.000000e+00 : f32
    %168 = vector.broadcast %cst_102 : f32 to vector<8x128xf32>
    %169 = arith.maximumf %167, %168 : vector<8x128xf32>
    %170 = arith.truncf %169 : vector<8x128xf32> to vector<8x128xbf16>
    %c56_103 = arith.constant 56 : index
    %c256_104 = arith.constant 256 : index
    %171 = vector.load %arg12[%c56_103, %c256_104] : memref<64x640xbf16, #tpu.memory_space<vmem>>, vector<8x128xbf16>
    tpu.vector_store %arg12[%c56_103, %c256_104], %170 {strides = array<i32>} : memref<64x640xbf16, #tpu.memory_space<vmem>>, vector<8x128xbf16>,
    %c48_105 = arith.constant 48 : index
    %c384_106 = arith.constant 384 : index
    %172 = vector.load %arg12[%c48_105, %c384_106] : memref<64x640xbf16, #tpu.memory_space<vmem>>, vector<8x128xbf16>
    tpu.vector_store %arg12[%c48_105, %c384_106], %170 {strides = array<i32>} : memref<64x640xbf16, #tpu.memory_space<vmem>>, vector<8x128xbf16>,
    %c40_107 = arith.constant 40 : index
    %c512_108 = arith.constant 512 : index
    %173 = vector.load %arg12[%c40_107, %c512_108] : memref<64x640xbf16, #tpu.memory_space<vmem>>, vector<8x128xbf16>
    tpu.vector_store %arg12[%c40_107, %c512_108], %170 {strides = array<i32>} : memref<64x640xbf16, #tpu.memory_space<vmem>>, vector<8x128xbf16>,
    %c160 = arith.constant 160 : index
    %c0_109 = arith.constant 0 : index
    %174 = vector.load %arg11[%c160, %c0_109] : memref<192x256xf32, #tpu.memory_space<vmem>>, vector<8x256xf32>
    %c168 = arith.constant 168 : index
    %c0_110 = arith.constant 0 : index
    %175 = vector.load %arg11[%c168, %c0_110] : memref<192x256xf32, #tpu.memory_space<vmem>>, vector<8x256xf32>
    %176 = vector.extract_strided_slice %174 {offsets = [0, 0], sizes = [8, 128], strides = [1, 1]} : vector<8x256xf32> to vector<8x128xf32>
    %177 = vector.extract_strided_slice %174 {offsets = [0, 128], sizes = [8, 128], strides = [1, 1]} : vector<8x256xf32> to vector<8x128xf32>
    %178 = arith.maximumf %176, %177 : vector<8x128xf32>
    %179 = vector.extract_strided_slice %175 {offsets = [0, 0], sizes = [8, 128], strides = [1, 1]} : vector<8x256xf32> to vector<8x128xf32>
    %180 = vector.extract_strided_slice %175 {offsets = [0, 128], sizes = [8, 128], strides = [1, 1]} : vector<8x256xf32> to vector<8x128xf32>
    %181 = arith.maximumf %179, %180 : vector<8x128xf32>
    %182 = arith.maximumf %178, %181 : vector<8x128xf32>
    %183 = arith.addf %182, %6 : vector<8x128xf32>
    %cst_111 = arith.constant 0.000000e+00 : f32
    %184 = vector.broadcast %cst_111 : f32 to vector<8x128xf32>
    %185 = arith.maximumf %183, %184 : vector<8x128xf32>
    %186 = arith.truncf %185 : vector<8x128xf32> to vector<8x128xbf16>
    %c56_112 = arith.constant 56 : index
    %c384_113 = arith.constant 384 : index
    %187 = vector.load %arg12[%c56_112, %c384_113] : memref<64x640xbf16, #tpu.memory_space<vmem>>, vector<8x128xbf16>
    tpu.vector_store %arg12[%c56_112, %c384_113], %186 {strides = array<i32>} : memref<64x640xbf16, #tpu.memory_space<vmem>>, vector<8x128xbf16>,
    %c48_114 = arith.constant 48 : index
    %c512_115 = arith.constant 512 : index
    %188 = vector.load %arg12[%c48_114, %c512_115] : memref<64x640xbf16, #tpu.memory_space<vmem>>, vector<8x128xbf16>
    tpu.vector_store %arg12[%c48_114, %c512_115], %186 {strides = array<i32>} : memref<64x640xbf16, #tpu.memory_space<vmem>>, vector<8x128xbf16>,
    %c176 = arith.constant 176 : index
    %c0_116 = arith.constant 0 : index
    %189 = vector.load %arg11[%c176, %c0_116] : memref<192x256xf32, #tpu.memory_space<vmem>>, vector<8x256xf32>
    %c184 = arith.constant 184 : index
    %c0_117 = arith.constant 0 : index
    %190 = vector.load %arg11[%c184, %c0_117] : memref<192x256xf32, #tpu.memory_space<vmem>>, vector<8x256xf32>
    %191 = vector.extract_strided_slice %189 {offsets = [0, 0], sizes = [8, 128], strides = [1, 1]} : vector<8x256xf32> to vector<8x128xf32>
    %192 = vector.extract_strided_slice %189 {offsets = [0, 128], sizes = [8, 128], strides = [1, 1]} : vector<8x256xf32> to vector<8x128xf32>
    %193 = arith.maximumf %191, %192 : vector<8x128xf32>
    %194 = vector.extract_strided_slice %190 {offsets = [0, 0], sizes = [8, 128], strides = [1, 1]} : vector<8x256xf32> to vector<8x128xf32>
    %195 = vector.extract_strided_slice %190 {offsets = [0, 128], sizes = [8, 128], strides = [1, 1]} : vector<8x256xf32> to vector<8x128xf32>
    %196 = arith.maximumf %194, %195 : vector<8x128xf32>
    %197 = arith.maximumf %193, %196 : vector<8x128xf32>
    %198 = arith.addf %197, %6 : vector<8x128xf32>
    %cst_118 = arith.constant 0.000000e+00 : f32
    %199 = vector.broadcast %cst_118 : f32 to vector<8x128xf32>
    %200 = arith.maximumf %198, %199 : vector<8x128xf32>
    %201 = arith.truncf %200 : vector<8x128xf32> to vector<8x128xbf16>
    %c56_119 = arith.constant 56 : index
    %c512_120 = arith.constant 512 : index
    %202 = vector.load %arg12[%c56_119, %c512_120] : memref<64x640xbf16, #tpu.memory_space<vmem>>, vector<8x128xbf16>
    tpu.vector_store %arg12[%c56_119, %c512_120], %201 {strides = array<i32>} : memref<64x640xbf16, #tpu.memory_space<vmem>>, vector<8x128xbf16>,
    %c0_121 = arith.constant 0 : index
    %c0_122 = arith.constant 0 : index
    %203 = vector.load %arg12[%c0_121, %c0_122] : memref<64x640xbf16, #tpu.memory_space<vmem>>, vector<64x640xbf16>
    %c0_123 = arith.constant 0 : index
    %c0_124 = arith.constant 0 : index
    %204 = vector.load %arg4[%c0_123, %c0_124] : memref<640x256xbf16, #tpu.memory_space<vmem>>, vector<640x256xbf16>
    %cst_125 = arith.constant dense<0.000000e+00> : vector<64x256xf32>
    %205 = tpu.matmul %203, %204, %cst_125 {dimension_numbers = #tpu.dot_dimension_numbers<[1], [0], [0], [1], [0, 0, 1, 1], [], []>} : vector<64x640xbf16>, vector<640x256xbf16>, vector<64x256xf32> -> vector<64x256xf32>
    %c0_126 = arith.constant 0 : index
    %c0_127 = arith.constant 0 : index
    %206 = vector.load %arg13[%c0_126, %c0_127] : memref<64x256xf32, #tpu.memory_space<vmem>>, vector<64x256xf32>
    tpu.vector_store %arg13[%c0_126, %c0_127], %205 {strides = array<i32>} : memref<64x256xf32, #tpu.memory_space<vmem>>, vector<64x256xf32>,
    %c0_128 = arith.constant 0 : index
    %c0_129 = arith.constant 0 : index
    %207 = vector.load %arg5[%c0_128, %c0_129] : memref<1x128xf32, #tpu.memory_space<vmem>>, vector<1x128xf32>
    %208 = vector.shape_cast %207 : vector<1x128xf32> to vector<1x128xf32>
    %209 = vector.broadcast %208 : vector<1x128xf32> to vector<8x128xf32>
    %c0_130 = arith.constant 0 : index
    %c0_131 = arith.constant 0 : index
    %210 = vector.load %arg13[%c0_130, %c0_131] : memref<64x256xf32, #tpu.memory_space<vmem>>, vector<8x256xf32>
    %c8_132 = arith.constant 8 : index
    %c0_133 = arith.constant 0 : index
    %211 = vector.load %arg13[%c8_132, %c0_133] : memref<64x256xf32, #tpu.memory_space<vmem>>, vector<8x256xf32>
    %212 = vector.extract_strided_slice %210 {offsets = [0, 0], sizes = [8, 128], strides = [1, 1]} : vector<8x256xf32> to vector<8x128xf32>
    %213 = vector.extract_strided_slice %210 {offsets = [0, 128], sizes = [8, 128], strides = [1, 1]} : vector<8x256xf32> to vector<8x128xf32>
    %214 = arith.maximumf %212, %213 : vector<8x128xf32>
    %215 = vector.extract_strided_slice %211 {offsets = [0, 0], sizes = [8, 128], strides = [1, 1]} : vector<8x256xf32> to vector<8x128xf32>
    %216 = vector.extract_strided_slice %211 {offsets = [0, 128], sizes = [8, 128], strides = [1, 1]} : vector<8x256xf32> to vector<8x128xf32>
    %217 = arith.maximumf %215, %216 : vector<8x128xf32>
    %218 = arith.maximumf %214, %217 : vector<8x128xf32>
    %219 = arith.addf %218, %209 : vector<8x128xf32>
    %cst_134 = arith.constant 0.000000e+00 : f32
    %220 = vector.broadcast %cst_134 : f32 to vector<8x128xf32>
    %221 = arith.maximumf %219, %220 : vector<8x128xf32>
    %222 = arith.truncf %221 : vector<8x128xf32> to vector<8x128xbf16>
    %c0_135 = arith.constant 0 : index
    %c0_136 = arith.constant 0 : index
    %223 = vector.load %arg14[%c0_135, %c0_136] : memref<8x512xbf16, #tpu.memory_space<vmem>>, vector<8x128xbf16>
    tpu.vector_store %arg14[%c0_135, %c0_136], %222 {strides = array<i32>} : memref<8x512xbf16, #tpu.memory_space<vmem>>, vector<8x128xbf16>,
    %c16_137 = arith.constant 16 : index
    %c0_138 = arith.constant 0 : index
    %224 = vector.load %arg13[%c16_137, %c0_138] : memref<64x256xf32, #tpu.memory_space<vmem>>, vector<8x256xf32>
    %c24_139 = arith.constant 24 : index
    %c0_140 = arith.constant 0 : index
    %225 = vector.load %arg13[%c24_139, %c0_140] : memref<64x256xf32, #tpu.memory_space<vmem>>, vector<8x256xf32>
    %226 = vector.extract_strided_slice %224 {offsets = [0, 0], sizes = [8, 128], strides = [1, 1]} : vector<8x256xf32> to vector<8x128xf32>
    %227 = vector.extract_strided_slice %224 {offsets = [0, 128], sizes = [8, 128], strides = [1, 1]} : vector<8x256xf32> to vector<8x128xf32>
    %228 = arith.maximumf %226, %227 : vector<8x128xf32>
    %229 = vector.extract_strided_slice %225 {offsets = [0, 0], sizes = [8, 128], strides = [1, 1]} : vector<8x256xf32> to vector<8x128xf32>
    %230 = vector.extract_strided_slice %225 {offsets = [0, 128], sizes = [8, 128], strides = [1, 1]} : vector<8x256xf32> to vector<8x128xf32>
    %231 = arith.maximumf %229, %230 : vector<8x128xf32>
    %232 = arith.maximumf %228, %231 : vector<8x128xf32>
    %233 = arith.addf %232, %209 : vector<8x128xf32>
    %cst_141 = arith.constant 0.000000e+00 : f32
    %234 = vector.broadcast %cst_141 : f32 to vector<8x128xf32>
    %235 = arith.maximumf %233, %234 : vector<8x128xf32>
    %236 = arith.truncf %235 : vector<8x128xf32> to vector<8x128xbf16>
    %c0_142 = arith.constant 0 : index
    %c128_143 = arith.constant 128 : index
    %237 = vector.load %arg14[%c0_142, %c128_143] : memref<8x512xbf16, #tpu.memory_space<vmem>>, vector<8x128xbf16>
    tpu.vector_store %arg14[%c0_142, %c128_143], %236 {strides = array<i32>} : memref<8x512xbf16, #tpu.memory_space<vmem>>, vector<8x128xbf16>,
    %c32_144 = arith.constant 32 : index
    %c0_145 = arith.constant 0 : index
    %238 = vector.load %arg13[%c32_144, %c0_145] : memref<64x256xf32, #tpu.memory_space<vmem>>, vector<8x256xf32>
    %c40_146 = arith.constant 40 : index
    %c0_147 = arith.constant 0 : index
    %239 = vector.load %arg13[%c40_146, %c0_147] : memref<64x256xf32, #tpu.memory_space<vmem>>, vector<8x256xf32>
    %240 = vector.extract_strided_slice %238 {offsets = [0, 0], sizes = [8, 128], strides = [1, 1]} : vector<8x256xf32> to vector<8x128xf32>
    %241 = vector.extract_strided_slice %238 {offsets = [0, 128], sizes = [8, 128], strides = [1, 1]} : vector<8x256xf32> to vector<8x128xf32>
    %242 = arith.maximumf %240, %241 : vector<8x128xf32>
    %243 = vector.extract_strided_slice %239 {offsets = [0, 0], sizes = [8, 128], strides = [1, 1]} : vector<8x256xf32> to vector<8x128xf32>
    %244 = vector.extract_strided_slice %239 {offsets = [0, 128], sizes = [8, 128], strides = [1, 1]} : vector<8x256xf32> to vector<8x128xf32>
    %245 = arith.maximumf %243, %244 : vector<8x128xf32>
    %246 = arith.maximumf %242, %245 : vector<8x128xf32>
    %247 = arith.addf %246, %209 : vector<8x128xf32>
    %cst_148 = arith.constant 0.000000e+00 : f32
    %248 = vector.broadcast %cst_148 : f32 to vector<8x128xf32>
    %249 = arith.maximumf %247, %248 : vector<8x128xf32>
    %250 = arith.truncf %249 : vector<8x128xf32> to vector<8x128xbf16>
    %c0_149 = arith.constant 0 : index
    %c256_150 = arith.constant 256 : index
    %251 = vector.load %arg14[%c0_149, %c256_150] : memref<8x512xbf16, #tpu.memory_space<vmem>>, vector<8x128xbf16>
    tpu.vector_store %arg14[%c0_149, %c256_150], %250 {strides = array<i32>} : memref<8x512xbf16, #tpu.memory_space<vmem>>, vector<8x128xbf16>,
    %c48_151 = arith.constant 48 : index
    %c0_152 = arith.constant 0 : index
    %252 = vector.load %arg13[%c48_151, %c0_152] : memref<64x256xf32, #tpu.memory_space<vmem>>, vector<8x256xf32>
    %c56_153 = arith.constant 56 : index
    %c0_154 = arith.constant 0 : index
    %253 = vector.load %arg13[%c56_153, %c0_154] : memref<64x256xf32, #tpu.memory_space<vmem>>, vector<8x256xf32>
    %254 = vector.extract_strided_slice %252 {offsets = [0, 0], sizes = [8, 128], strides = [1, 1]} : vector<8x256xf32> to vector<8x128xf32>
    %255 = vector.extract_strided_slice %252 {offsets = [0, 128], sizes = [8, 128], strides = [1, 1]} : vector<8x256xf32> to vector<8x128xf32>
    %256 = arith.maximumf %254, %255 : vector<8x128xf32>
    %257 = vector.extract_strided_slice %253 {offsets = [0, 0], sizes = [8, 128], strides = [1, 1]} : vector<8x256xf32> to vector<8x128xf32>
    %258 = vector.extract_strided_slice %253 {offsets = [0, 128], sizes = [8, 128], strides = [1, 1]} : vector<8x256xf32> to vector<8x128xf32>
    %259 = arith.maximumf %257, %258 : vector<8x128xf32>
    %260 = arith.maximumf %256, %259 : vector<8x128xf32>
    %261 = arith.addf %260, %209 : vector<8x128xf32>
    %cst_155 = arith.constant 0.000000e+00 : f32
    %262 = vector.broadcast %cst_155 : f32 to vector<8x128xf32>
    %263 = arith.maximumf %261, %262 : vector<8x128xf32>
    %264 = arith.truncf %263 : vector<8x128xf32> to vector<8x128xbf16>
    %c0_156 = arith.constant 0 : index
    %c384_157 = arith.constant 384 : index
    %265 = vector.load %arg14[%c0_156, %c384_157] : memref<8x512xbf16, #tpu.memory_space<vmem>>, vector<8x128xbf16>
    tpu.vector_store %arg14[%c0_156, %c384_157], %264 {strides = array<i32>} : memref<8x512xbf16, #tpu.memory_space<vmem>>, vector<8x128xbf16>,
    %c0_158 = arith.constant 0 : index
    %c0_159 = arith.constant 0 : index
    %266 = vector.load %arg14[%c0_158, %c0_159] : memref<8x512xbf16, #tpu.memory_space<vmem>>, vector<8x512xbf16>
    %c0_160 = arith.constant 0 : index
    %c0_161 = arith.constant 0 : index
    %267 = vector.load %arg6[%c0_160, %c0_161] : memref<512x128xbf16, #tpu.memory_space<vmem>>, vector<512x128xbf16>
    %cst_162 = arith.constant dense<0.000000e+00> : vector<8x128xf32>
    %268 = tpu.matmul %266, %267, %cst_162 {dimension_numbers = #tpu.dot_dimension_numbers<[1], [0], [0], [1], [0, 0, 1, 1], [], []>} : vector<8x512xbf16>, vector<512x128xbf16>, vector<8x128xf32> -> vector<8x128xf32>
    %c0_163 = arith.constant 0 : index
    %c0_164 = arith.constant 0 : index
    %269 = vector.load %arg7[%c0_163, %c0_164] : memref<1x128xf32, #tpu.memory_space<vmem>>, vector<1x128xf32>
    %270 = vector.broadcast %269 : vector<1x128xf32> to vector<8x128xf32>
    %271 = arith.addf %268, %270 : vector<8x128xf32>
    %cst_165 = arith.constant 0.000000e+00 : f32
    %272 = vector.broadcast %cst_165 : f32 to vector<8x128xf32>
    %273 = arith.maximumf %271, %272 : vector<8x128xf32>
    %274 = arith.truncf %273 : vector<8x128xf32> to vector<8x128xbf16>
    %c0_166 = arith.constant 0 : index
    %c0_167 = arith.constant 0 : index
    %275 = vector.load %arg8[%c0_166, %c0_167] : memref<128x128xbf16, #tpu.memory_space<vmem>>, vector<128x128xbf16>
    %cst_168 = arith.constant dense<0.000000e+00> : vector<8x128xf32>
    %276 = tpu.matmul %274, %275, %cst_168 {dimension_numbers = #tpu.dot_dimension_numbers<[1], [0], [0], [1], [0, 0, 1, 1], [], []>} : vector<8x128xbf16>, vector<128x128xbf16>, vector<8x128xf32> -> vector<8x128xf32>
    %c0_169 = arith.constant 0 : index
    %c0_170 = arith.constant 0 : index
    %277 = vector.load %arg9[%c0_169, %c0_170] : memref<1x128xf32, #tpu.memory_space<vmem>>, vector<1x128xf32>
    %278 = vector.broadcast %277 : vector<1x128xf32> to vector<8x128xf32>
    %279 = arith.addf %276, %278 : vector<8x128xf32>
    %c0_171 = arith.constant 0 : index
    %c0_172 = arith.constant 0 : index
    %280 = vector.load %arg10[%c0_171, %c0_172] : memref<8x128xf32, #tpu.memory_space<vmem>>, vector<8x128xf32>
    tpu.vector_store %arg10[%c0_171, %c0_172], %279 {strides = array<i32>} : memref<8x128xf32, #tpu.memory_space<vmem>>, vector<8x128xf32>,
    return
  }
  func.func @transform_0(%arg0: i32) -> (i32, i32) {
    %c0_i32 = arith.constant 0 : i32
    %c0_i32_0 = arith.constant 0 : i32
    return %arg0, %c0_i32 : i32, i32
  }
  func.func @transform_1(%arg0: i32) -> (i32, i32) {
    %c0_i32 = arith.constant 0 : i32
    %c0_i32_0 = arith.constant 0 : i32
    %c0_i32_1 = arith.constant 0 : i32
    return %c0_i32, %c0_i32_0 : i32, i32
  }
  func.func @transform_2(%arg0: i32) -> (i32, i32) {
    %c0_i32 = arith.constant 0 : i32
    %c0_i32_0 = arith.constant 0 : i32
    %c0_i32_1 = arith.constant 0 : i32
    return %c0_i32, %c0_i32_0 : i32, i32
  }
  func.func @transform_3(%arg0: i32) -> (i32, i32) {
    %c0_i32 = arith.constant 0 : i32
    %c0_i32_0 = arith.constant 0 : i32
    %c0_i32_1 = arith.constant 0 : i32
    return %c0_i32, %c0_i32_0 : i32, i32
  }
  func.func @transform_4(%arg0: i32) -> (i32, i32) {
    %c0_i32 = arith.constant 0 : i32
    %c0_i32_0 = arith.constant 0 : i32
    %c0_i32_1 = arith.constant 0 : i32
    return %c0_i32, %c0_i32_0 : i32, i32
  }
  func.func @transform_5(%arg0: i32) -> (i32, i32) {
    %c0_i32 = arith.constant 0 : i32
    %c0_i32_0 = arith.constant 0 : i32
    %c0_i32_1 = arith.constant 0 : i32
    return %c0_i32, %c0_i32_0 : i32, i32
  }
  func.func @transform_6(%arg0: i32) -> (i32, i32) {
    %c0_i32 = arith.constant 0 : i32
    %c0_i32_0 = arith.constant 0 : i32
    %c0_i32_1 = arith.constant 0 : i32
    return %c0_i32, %c0_i32_0 : i32, i32
  }
  func.func @transform_7(%arg0: i32) -> (i32, i32) {
    %c0_i32 = arith.constant 0 : i32
    %c0_i32_0 = arith.constant 0 : i32
    %c0_i32_1 = arith.constant 0 : i32
    return %c0_i32, %c0_i32_0 : i32, i32
  }
  func.func @transform_8(%arg0: i32) -> (i32, i32) {
    %c0_i32 = arith.constant 0 : i32
    %c0_i32_0 = arith.constant 0 : i32
    %c0_i32_1 = arith.constant 0 : i32
    return %c0_i32, %c0_i32_0 : i32, i32
  }
  func.func @transform_9(%arg0: i32) -> (i32, i32) {
    %c0_i32 = arith.constant 0 : i32
    %c0_i32_0 = arith.constant 0 : i32
    return %arg0, %c0_i32 : i32, i32
  }
}

</mosaic_0001>

<bundles_post_ra>
// kernel: cnn_mnist_forward.1
= control target key start
LH: loop header
LB: loop body
LE: loop exit
PB: predicated region body
PF: predicated region fallthrough
CT: control target
= control target key end

     0   :  { %vm285_vm0 = vcmask 261120   ;;  %vm2601_vm1 = vmmov 0   ;;  %s3216_s1 = inlined_call_operand.vmem [shape: bf16[160,256], index: 1, kind: input, shape index: {}]   ;;  %s3217_s0 = inlined_call_operand.vmem [shape: bf16[192,160], index: 0, kind: input, shape index: {}]   ;;  %s3218_s3 = inlined_call_operand.vmem [shape: bf16[640,256], index: 3, kind: input, shape index: {}]   ;;  %s3219_s2 = inlined_call_operand.vmem [shape: f32[1,128], index: 2, kind: input, shape index: {}]   ;;  %s3220_s5 = inlined_call_operand.vmem [shape: bf16[512,128], index: 5, kind: input, shape index: {}]   ;;  %s3221_s7 = inlined_call_operand.vmem [shape: bf16[128,128], index: 7, kind: input, shape index: {}]   ;;  %s3222_s4 = inlined_call_operand.vmem [shape: f32[1,128], index: 4, kind: input, shape index: {}]   ;;  %s3223_s6 = inlined_call_operand.vmem [shape: f32[1,128], index: 6, kind: input, shape index: {}]   ;;  %s3224_s8 = inlined_call_operand.vmem [shape: f32[1,128], index: 8, kind: input, shape index: {}]   ;;  %s3225_s9 = inlined_call_operand.vmem [shape: f32[8,128], index: 9, kind: output, shape index: {}]  }
   0x1   :  { %v2341_v0 = vld [vmem:[%s3216_s1 + $0x74] ss:$8 sps:$4 sm:$0xff]   ;;  %v2343_v1 = vld [vmem:[%s3216_s1 + $0x70] ss:$8 sps:$4 sm:$0xff]   ;;  %v2344_v2 = vld [vmem:[%s3216_s1 + $0x64] ss:$8 sps:$4 sm:$0xff]  }
   0x2   :  { %322 = vmatprep.subr.bf16.mxu0 %v2341_v0  ;;  %v2346_v3 = vld [vmem:[%s3216_s1 + $0x60] ss:$8 sps:$4 sm:$0xff]   ;;  %v2347_v4 = vld [vmem:[%s3216_s1 + $0x54] ss:$8 sps:$4 sm:$0xff]   ;;  %v2349_v5 = vld [vmem:[%s3216_s1 + $0x50] ss:$8 sps:$4 sm:$0xff]  }
   0x3   :  { %323 = vmatpush1.bf16.msra.mxu0 %v2343_v1  ;;  %v2350_v6 = vld [vmem:[%s3216_s1 + $0x44] ss:$8 sps:$4 sm:$0xff]   ;;  %v2352_v7 = vld [vmem:[%s3216_s1 + $0x40] ss:$8 sps:$4 sm:$0xff]   ;;  %v2353_v8 = vld [vmem:[%s3216_s1 + $0x34] ss:$8 sps:$4 sm:$0xff]  }
   0x4   :  { %324 = vmatprep.subr.bf16.mxu0 %v2344_v2  ;;  %v2373_v9 = vld [vmem:[%s3217_s0 + $0x4] ss:$8 sps:$4 sm:$0xff]   ;;  %v2355_v10 = vld [vmem:[%s3216_s1 + $0x30] ss:$8 sps:$4 sm:$0xff]   ;;  %v2358_v12 = vld [vmem:[%s3216_s1 + $0x20] ss:$8 sps:$4 sm:$0xff]  }
   0x5   :  { %v2356_v11 = vld [vmem:[%s3216_s1 + $0x24] ss:$8 sps:$4 sm:$0xff]   ;;  %2105 = vmatprep.mubr.msk.bf16.mxu0 %vm285_vm0, %v2373_v9  ;;  %v2359_v13 = vld [vmem:[%s3216_s1 + $0x14] ss:$8 sps:$4 sm:$0xff]   ;;  %v2361_v14 = vld [vmem:[%s3216_s1 + $0x10] ss:$8 sps:$4 sm:$0xff]  }
   0x6   :  { %v2362_v15 = vld [vmem:[%s3216_s1 + $0x4] ss:$8 sps:$4 sm:$0xff]   ;;  %v2364_v16 = vld [vmem:[%s3216_s1] ss:$8 sps:$4 sm:$0xff]   ;;  %v2365_v17 = vld [vmem:[%s3216_s1 + $0x94] ss:$8 sps:$4 sm:$0xff]  }
   0x7   :  { %325 = vmatpush1.bf16.msra.mxu0 %v2346_v3  ;;  %v2407_v18 = vld [vmem:[%s3218_s3 + $0x74] ss:$8 sps:$4 sm:$0xff]   ;;  %v2409_v19 = vld [vmem:[%s3218_s3 + $0x70] ss:$8 sps:$4 sm:$0xff]   ;;  %v2410_v21 = vld [vmem:[%s3218_s3 + $0x64] ss:$8 sps:$4 sm:$0xff]  }
   0x8   :  { %326 = vmatprep.subr.bf16.mxu0 %v2347_v4  ;;  %v2367_v20 = vld [vmem:[%s3216_s1 + $0x90] ss:$8 sps:$4 sm:$0xff]   ;;  %v2368_v22 = vld [vmem:[%s3216_s1 + $0x84] ss:$8 sps:$4 sm:$0xff]   ;;  %1298 = vmatprep.subr.bf16.mxu1 %v2407_v18  ;;  %v2412_v23 = vld [vmem:[%s3218_s3 + $0x60] ss:$8 sps:$4 sm:$0xff]  }
   0x9   :  { %1299 = vmatpush1.bf16.msra.mxu1 %v2409_v19  ;;  %v2413_v24 = vld [vmem:[%s3218_s3 + $0x54] ss:$8 sps:$4 sm:$0xff]   ;;  %v2370_v25 = vld [vmem:[%s3216_s1 + $0x80] ss:$8 sps:$4 sm:$0xff]   ;;  %v2415_v26 = vld [vmem:[%s3218_s3 + $0x50] ss:$8 sps:$4 sm:$0xff]  }
   0xa   :  { %1300 = vmatprep.subr.bf16.mxu1 %v2410_v21  ;;  %v2371_v27 = vld [vmem:[%s3217_s0] ss:$8 sps:$4 sm:$0xff]   ;;  %v2416_v28 = vld [vmem:[%s3218_s3 + $0x44] ss:$8 sps:$4 sm:$0xff]   ;;  %v2374_v29 = vld [vmem:[%s3217_s0 + $0x14] ss:$8 sps:$4 sm:$0xff]  }
   0xb   :  { %327 = vmatpush1.bf16.msra.mxu0 %v2349_v5  ;;  %v2418_v30 = vld [vmem:[%s3218_s3 + $0x40] ss:$8 sps:$4 sm:$0xff]   ;;  %v2419_v31 = vld [vmem:[%s3218_s3 + $0x34] ss:$8 sps:$4 sm:$0xff]   ;;  %v2421_v32 = vld [vmem:[%s3218_s3 + $0x30] ss:$8 sps:$4 sm:$0xff]  }
   0xc   :  { %328 = vmatprep.subr.bf16.mxu0 %v2350_v6  ;;  %v2376_v33 = vld [vmem:[%s3217_s0 + $0x10] ss:$8 sps:$4 sm:$0xff]   ;;  %v2422_v34 = vld [vmem:[%s3218_s3 + $0x24] ss:$8 sps:$4 sm:$0xff]   ;;  %v2379_v36 = vld [vmem:[%s3217_s0 + $0x20] ss:$8 sps:$4 sm:$0xff]  }
   0xd   :  { %1301 = vmatpush1.bf16.msra.mxu1 %v2412_v23  ;;  %v2377_v35 = vld [vmem:[%s3217_s0 + $0x24] ss:$8 sps:$4 sm:$0xff]   ;;  %v2380_v37 = vld [vmem:[%s3217_s0 + $0x34] ss:$8 sps:$4 sm:$0xff]   ;;  %v2382_v38 = vld [vmem:[%s3217_s0 + $0x30] ss:$8 sps:$4 sm:$0xff]  }
   0xe   :  { %1302 = vmatprep.subr.bf16.mxu1 %v2413_v24  ;;  %v2383_v39 = vld [vmem:[%s3217_s0 + $0x44] ss:$8 sps:$4 sm:$0xff]   ;;  %v2385_v40 = vld [vmem:[%s3217_s0 + $0x40] ss:$8 sps:$4 sm:$0xff]   ;;  %v2386_v41 = vld [vmem:[%s3217_s0 + $0x54] ss:$8 sps:$4 sm:$0xff]  }
   0xf   :  { %329 = vmatpush1.bf16.msra.mxu0 %v2352_v7  ;;  %v2388_v42 = vld [vmem:[%s3217_s0 + $0x50] ss:$8 sps:$4 sm:$0xff]   ;;  %v2389_v43 = vld [vmem:[%s3217_s0 + $0x64] ss:$8 sps:$4 sm:$0xff]   ;;  %v2391_v44 = vld [vmem:[%s3217_s0 + $0x60] ss:$8 sps:$4 sm:$0xff]  }
  0x10   :  { %330 = vmatprep.subr.bf16.mxu0 %v2353_v8  ;;  %v2392_v45 = vld [vmem:[%s3217_s0 + $0x74] ss:$8 sps:$4 sm:$0xff]   ;;  %v2394_v46 = vld [vmem:[%s3217_s0 + $0x70] ss:$8 sps:$4 sm:$0xff]   ;;  %v2395_v47 = vld [vmem:[%s3217_s0 + $0x84] ss:$8 sps:$4 sm:$0xff]  }
  0x11   :  { %1303 = vmatpush1.bf16.msra.mxu1 %v2415_v26  ;;  %v2397_v48 = vld [vmem:[%s3217_s0 + $0x80] ss:$8 sps:$4 sm:$0xff]   ;;  %v2398_v49 = vld [vmem:[%s3217_s0 + $0x94] ss:$8 sps:$4 sm:$0xff]   ;;  %v2427_v52 = vld [vmem:[%s3218_s3 + $0x10] ss:$8 sps:$4 sm:$0xff]  }
  0x12   :  { %1304 = vmatprep.subr.bf16.mxu1 %v2416_v28  ;;  %v2424_v50 = vld [vmem:[%s3218_s3 + $0x20] ss:$8 sps:$4 sm:$0xff]   ;;  %v2425_v51 = vld [vmem:[%s3218_s3 + $0x14] ss:$8 sps:$4 sm:$0xff]   ;;  %v2400_v53 = vld [vmem:[%s3217_s0 + $0x90] ss:$8 sps:$4 sm:$0xff]  }
  0x13   :  { %331 = vmatpush1.bf16.msra.mxu0 %v2355_v10  ;;  %v2428_v54 = vld [vmem:[%s3218_s3 + $0x4] ss:$8 sps:$4 sm:$0xff]   ;;  %v2430_v56 = vld [vmem:[%s3218_s3] ss:$8 sps:$4 sm:$0xff]   ;;  %v2431_v57 = vld [vmem:[%s3218_s3 + $0xf4] ss:$8 sps:$4 sm:$0xff]  }
  0x14   :  { %332 = vmatprep.subr.bf16.mxu0 %v2356_v11  ;;  %v2401_v55 = vld [vmem:[%s3217_s0 + $0xa4] ss:$8 sps:$4 sm:$0xff]   ;;  %v2433_v58 = vld [vmem:[%s3218_s3 + $0xf0] ss:$8 sps:$4 sm:$0xff]   ;;  %v2403_v59 = vld [vmem:[%s3217_s0 + $0xa0] ss:$8 sps:$4 sm:$0xff]  }
  0x15   :  { %1305 = vmatpush1.bf16.msra.mxu1 %v2418_v30  ;;  %v2437_v60 = vld [vmem:[%s3218_s3 + $0xe4] ss:$8 sps:$4 sm:$0xff]   ;;  %v2404_v61 = vld [vmem:[%s3217_s0 + $0xb4] ss:$8 sps:$4 sm:$0xff]   ;;  %v2439_v62 = vld [vmem:[%s3218_s3 + $0xe0] ss:$8 sps:$4 sm:$0xff]  }
  0x16   :  { %1306 = vmatprep.subr.bf16.mxu1 %v2419_v31  ;;  %v2440_v63 = vld [vmem:[%s3218_s3 + $0xd4] ss:$8 sps:$4 sm:$0xff]   ;;  %v2434_v0 = vld [vmem:[%s3218_s3 + $0x270] ss:$8 sps:$4 sm:$0xff]   ;;  %v2443_v4 = vld [vmem:[%s3218_s3 + $0xc4] ss:$8 sps:$4 sm:$0xff]  }
  0x17   :  { %333 = vmatpush1.bf16.msra.mxu0 %v2358_v12  ;;  %v2436_v1 = vld [vmem:[%s3218_s3 + $0x274] ss:$8 sps:$4 sm:$0xff]   ;;  %v2442_v2 = vld [vmem:[%s3218_s3 + $0xd0] ss:$8 sps:$4 sm:$0xff]   ;;  %v2445_v5 = vld [vmem:[%s3218_s3 + $0xc0] ss:$8 sps:$4 sm:$0xff]  }
  0x18   :  { %334 = vmatprep.subr.bf16.mxu0 %v2359_v13  ;;  %v2406_v3 = vld [vmem:[%s3217_s0 + $0xb0] ss:$8 sps:$4 sm:$0xff]   ;;  %v2449_v6 = vld [vmem:[%s3218_s3 + $0xb4] ss:$8 sps:$4 sm:$0xff]   ;;  %v2452_v8 = vld [vmem:[%s3218_s3 + $0xa4] ss:$8 sps:$4 sm:$0xff]  }
  0x19   :  { %1307 = vmatpush1.bf16.msra.mxu1 %v2421_v32  ;;  %v2451_v7 = vld [vmem:[%s3218_s3 + $0xb0] ss:$8 sps:$4 sm:$0xff]   ;;  %v2454_v9 = vld [vmem:[%s3218_s3 + $0xa0] ss:$8 sps:$4 sm:$0xff]   ;;  %v2455_v10 = vld [vmem:[%s3218_s3 + $0x94] ss:$8 sps:$4 sm:$0xff]  }
  0x1a   :  { %1308 = vmatprep.subr.bf16.mxu1 %v2422_v34  ;;  %v2446_v11 = vld [vmem:[%s3218_s3 + $0x260] ss:$8 sps:$4 sm:$0xff]   ;;  %v2448_v12 = vld [vmem:[%s3218_s3 + $0x264] ss:$8 sps:$4 sm:$0xff]   ;;  %v2457_v13 = vld [vmem:[%s3218_s3 + $0x90] ss:$8 sps:$4 sm:$0xff]  }
  0x1b   :  { %335 = vmatpush1.bf16.msra.mxu0 %v2361_v14  ;;  %v2461_v14 = vld [vmem:[%s3218_s3 + $0x84] ss:$8 sps:$4 sm:$0xff]   ;;  %v2458_v18 = vld [vmem:[%s3218_s3 + $0x250] ss:$8 sps:$4 sm:$0xff]   ;;  %v2481_v21 = vld [vmem:[%s3218_s3 + $0x234] ss:$8 sps:$4 sm:$0xff]  }
  0x1c   :  { %336 = vmatprep.subr.bf16.mxu0 %v2362_v15  ;;  %v2463_v15 = vld [vmem:[%s3218_s3 + $0x80] ss:$8 sps:$4 sm:$0xff]   ;;  %v2475_v19 = vld [vmem:[%s3218_s3 + $0x244] ss:$8 sps:$4 sm:$0xff]   ;;  %v2493_v26 = vld [vmem:[%s3218_s3 + $0x210] ss:$8 sps:$4 sm:$0xff]  }
  0x1d   :  { %1309 = vmatpush1.bf16.msra.mxu1 %v2424_v50  ;;  %v2487_v23 = vld [vmem:[%s3218_s3 + $0x224] ss:$8 sps:$4 sm:$0xff]   ;;  %v2485_v24 = vld [vmem:[%s3218_s3 + $0x220] ss:$8 sps:$4 sm:$0xff]  }
  0x1e   :  { %1310 = vmatprep.subr.bf16.mxu1 %v2425_v51  ;;  %v2500_v28 = vld [vmem:[%s3218_s3 + $0x200] ss:$8 sps:$4 sm:$0xff]  }
  0x1f   :  { %337 = vmatpush1.bf16.msra.mxu0 %v2364_v16  ;;  %v2460_v16 = vld [vmem:[%s3218_s3 + $0x254] ss:$8 sps:$4 sm:$0xff]  }
  0x20   :  { %350 = vmatprep.subr.bf16.mxu0 %v2365_v17  ;;  %v2469_v17 = vld [vmem:[%s3218_s3 + $0x174] ss:$8 sps:$4 sm:$0xff]  }
  0x21   :  { %1311 = vmatpush1.bf16.msra.mxu1 %v2427_v52 }
  0x22   :  { %1312 = vmatprep.subr.bf16.mxu1 %v2428_v54 }
  0x23   :  { %351 = vmatpush2.bf16.msra.mxu0 %v2367_v20  ;;  %v2473_v20 = vld [vmem:[%s3218_s3 + $0x240] ss:$8 sps:$4 sm:$0xff]  }
  0x24   :  { %352 = vmatprep.subr.bf16.mxu0 %v2368_v22  ;;  %v2479_v22 = vld [vmem:[%s3218_s3 + $0x230] ss:$8 sps:$4 sm:$0xff]  }
  0x25   :  { %1313 = vmatpush1.bf16.msra.mxu1 %v2430_v56 }
  0x26   :  { %1314 = vmatprep.subr.bf16.mxu1 %v2431_v57 }
  0x27   :  { %353 = vmatpush2.bf16.msra.mxu0 %v2370_v25  ;;  %v2495_v25 = vld [vmem:[%s3218_s3 + $0x214] ss:$8 sps:$4 sm:$0xff]  }
  0x28   :  { %1444 = vmatprep.subr.bf16.mxu0 %v2436_v1 }
  0x29   :  { %1315 = vmatpush2.bf16.msra.mxu1 %v2433_v58 }
  0x2a   :  { %355 = vmatmul.mubr.bf16.vlgmr.msra.gmra.mxu0 %v2371_v27  ;;  %1316 = vmatprep.subr.bf16.mxu1 %v2437_v60  ;;  %v2502_v27 = vld [vmem:[%s3218_s3 + $0x204] ss:$8 sps:$4 sm:$0xff]  }
  0x2b   :  { %2106 = vmatprep.mubr.msk.bf16.mxu0 %vm285_vm0, %v2374_v29  ;;  %1445 = vmatpush1.bf16.msra.mxu0 %v2434_v0  ;;  %v2599_v29 = vmov 0  }
  0x2c   :  { %1446 = vmatprep.subr.bf16.mxu0 %v2448_v12 }
  0x2d   :  { %1317 = vmatpush2.bf16.msra.mxu1 %v2439_v62 }
  0x2e   :  { %1318 = vmatprep.subr.bf16.mxu1 %v2440_v63 }
  0x2f   :  { %1447 = vmatpush1.bf16.msra.mxu0 %v2446_v11 }
  0x30   :  { %1448 = vmatprep.subr.bf16.mxu0 %v2460_v16 }
  0x31   :  { %1319 = vmatpush2.bf16.msra.mxu1 %v2442_v2 }
  0x32   :  { %365 = vmatmul.mubr.bf16.gmra.mxu0 %v2376_v33  ;;  %1320 = vmatprep.subr.bf16.mxu1 %v2443_v4 }
  0x33   :  { %2107 = vmatprep.mubr.msk.bf16.mxu0 %vm285_vm0, %v2377_v35  ;;  %1449 = vmatpush1.bf16.msra.mxu0 %v2458_v18  ;;  %v2472_v18 = vld [vmem:[%s3218_s3 + $0x164] ss:$8 sps:$4 sm:$0xff]  }
  0x34   :  { %1450 = vmatprep.subr.bf16.mxu0 %v2475_v19 }
  0x35   :  { %1321 = vmatpush2.bf16.msra.mxu1 %v2445_v5 }
  0x36   :  { %1322 = vmatprep.subr.bf16.mxu1 %v2449_v6 }
  0x37   :  { %1451 = vmatpush1.bf16.msra.mxu0 %v2473_v20 }
  0x38   :  { %1452 = vmatprep.subr.bf16.mxu0 %v2481_v21 }
  0x39   :  { %1323 = vmatpush2.bf16.msra.mxu1 %v2451_v7 }
  0x3a   :  { %375 = vmatmul.mubr.bf16.gmra.mxu0 %v2379_v36  ;;  %1324 = vmatprep.subr.bf16.mxu1 %v2452_v8  ;;  %v2947_v36 = vld [vmem:[%s3219_s2] ss:$0 sm:$0xff] }
  0x3b   :  { %2108 = vmatprep.mubr.msk.bf16.mxu0 %vm285_vm0, %v2380_v37  ;;  %1453 = vmatpush1.bf16.msra.mxu0 %v2479_v22  ;;  %v2470_v22 = vld [vmem:[%s3218_s3 + $0x160] ss:$8 sps:$4 sm:$0xff]  }
  0x3c   :  { %1454 = vmatprep.subr.bf16.mxu0 %v2487_v23 }
  0x3d   :  { %1325 = vmatpush2.bf16.msra.mxu1 %v2454_v9 }
  0x3e   :  { %1326 = vmatprep.subr.bf16.mxu1 %v2455_v10 }
  0x3f   :  { %1455 = vmatpush1.bf16.msra.mxu0 %v2485_v24 }
  0x40   :  { %1456 = vmatprep.subr.bf16.mxu0 %v2495_v25  ;;  %v2478_v25 = vld [vmem:[%s3218_s3 + $0x154] ss:$8 sps:$4 sm:$0xff]  }
  0x41   :  { %1327 = vmatpush2.bf16.msra.mxu1 %v2457_v13  ;;  %v2467_v13 = vld [vmem:[%s3218_s3 + $0x170] ss:$8 sps:$4 sm:$0xff]  }
  0x42   :  { %385 = vmatmul.mubr.bf16.gmra.mxu0 %v2382_v38  ;;  %1328 = vmatprep.subr.bf16.mxu1 %v2461_v14 }
  0x43   :  { %2109 = vmatprep.mubr.msk.bf16.mxu0 %vm285_vm0, %v2383_v39  ;;  %1457 = vmatpush1.bf16.msra.mxu0 %v2493_v26 }
  0x44   :  { %1458 = vmatprep.subr.bf16.mxu0 %v2502_v27 }
  0x45   :  { %1329 = vmatpush2.bf16.msra.mxu1 %v2463_v15 }
  0x46   :  { %1371 = vmatprep.subr.bf16.mxu1 %v2469_v17 }
  0x47   :  { %1459 = vmatpush1.bf16.msra.mxu0 %v2500_v28 }
  0x4a   :  { %395 = vmatmul.mubr.bf16.gmra.mxu0 %v2385_v40 }
  0x4b   :  { %2110 = vmatprep.mubr.msk.bf16.mxu0 %vm285_vm0, %v2386_v41 }
  0x52   :  { %405 = vmatmul.mubr.bf16.gmra.mxu0 %v2388_v42 }
  0x53   :  { %2111 = vmatprep.mubr.msk.bf16.mxu0 %vm285_vm0, %v2389_v43 }
  0x5a   :  { %415 = vmatmul.mubr.bf16.gmra.mxu0 %v2391_v44 }
  0x5b   :  { %2112 = vmatprep.mubr.msk.bf16.mxu0 %vm285_vm0, %v2392_v45 }
  0x62   :  { %425 = vmatmul.mubr.bf16.gmra.mxu0 %v2394_v46 }
  0x63   :  { %2113 = vmatprep.mubr.msk.bf16.mxu0 %vm285_vm0, %v2395_v47 }
  0x6a   :  { %435 = vmatmul.mubr.bf16.gmra.mxu0 %v2397_v48 }
  0x6b   :  { %2114 = vmatprep.mubr.msk.bf16.mxu0 %vm285_vm0, %v2398_v49 }
  0x72   :  { %445 = vmatmul.mubr.bf16.gmra.mxu0 %v2400_v53 }
  0x73   :  { %2115 = vmatprep.mubr.msk.bf16.mxu0 %vm285_vm0, %v2401_v55 }
  0x7a   :  { %455 = vmatmul.mubr.bf16.gmra.mxu0 %v2403_v59 }
  0x7b   :  { %2116 = vmatprep.mubr.msk.bf16.mxu0 %vm285_vm0, %v2404_v61 }
  0x82   :  { %465 = vmatmul.mubr.bf16.gmra.mxu0 %v2406_v3 }
  0x83   :  { %1476 = vmatprep.mubr.bf16.mxu0 %v2599_v29 }
  0xea   :  { %v356_v30 = vpop.f32.mrf.mxu0 }
  0xec   :  { %v358_v31 = vpop.f32.mrf.mxu0 }
  0xed   :  { %v534_v34 = vmax.f32 %v356_v30, %v358_v31  ;;  %v2476_v31 = vld [vmem:[%s3218_s3 + $0x150] ss:$8 sps:$4 sm:$0xff]  }
  0xee   :  { %v360_v32 = vpop.f32.mrf.mxu0 }
  0xf0   :  { %v362_v33 = vpop.f32.mrf.mxu0 }
  0xf1   :  { %v535_v35 = vmax.f32 %v360_v32, %v362_v33  ;;  %v2484_v33 = vld [vmem:[%s3218_s3 + $0x144] ss:$8 sps:$4 sm:$0xff]  }
  0xf2   :  { %v366_v37 = vpop.f32.mrf.mxu0 }
  0xf3   :  { %v536_v38 = vmax.f32 %v534_v34, %v535_v35 }
  0xf4   :  { %v368_v39 = vpop.f32.mrf.mxu0 }
  0xf5   :  { %v537_v40 = vadd.f32 %v2947_v36, %v536_v38  ;;  %v545_v45 = vmax.f32 %v366_v37, %v368_v39  ;;  %v2482_v38 = vld [vmem:[%s3218_s3 + $0x140] ss:$8 sps:$4 sm:$0xff]  }
  0xf6   :  { %v370_v41 = vpop.f32.mrf.mxu0 }
  0xf7   :  { %v538_v42 = vmax.f32 %v537_v40, 0.0 }
  0xf8   :  { %v372_v43 = vpop.f32.mrf.mxu0 }
  0xf9   :  { %v539_v44 = vpack.c.bf16 %v538_v42, %v538_v42  ;;  %v546_v46 = vmax.f32 %v370_v41, %v372_v43  ;;  %v2492_v41 = vld [vmem:[%s3218_s3 + $0x134] ss:$8 sps:$4 sm:$0xff]  }
  0xfa   :  { %v376_v47 = vpop.f32.mrf.mxu0 }
  0xfb   :  { %540 = vst [vmem:[#allocation3] sm:$0xf] %v539_v44  ;;  %v547_v48 = vmax.f32 %v545_v45, %v546_v46  ;;  %v2490_v45 = vld [vmem:[%s3218_s3 + $0x130] ss:$8 sps:$4 sm:$0xff]  }
  0xfc   :  { %v378_v49 = vpop.f32.mrf.mxu0 }
  0xfd   :  { %v548_v50 = vadd.f32 %v2947_v36, %v547_v48  ;;  %v557_v55 = vmax.f32 %v376_v47, %v378_v49 }
  0xfe   :  { %v380_v51 = vpop.f32.mrf.mxu0 }
  0xff   :  { %v549_v52 = vmax.f32 %v548_v50, 0.0  ;;  %v2499_v50 = vld [vmem:[%s3218_s3 + $0x124] ss:$8 sps:$4 sm:$0xff]  }
 0x100   :  { %v382_v53 = vpop.f32.mrf.mxu0 }
 0x101   :  { %v550_v54 = vpack.c.bf16 %v549_v52, %v549_v52  ;;  %v558_v56 = vmax.f32 %v380_v51, %v382_v53 }
 0x102   :  { %v386_v57 = vpop.f32.mrf.mxu0 }
 0x103   :  { %551 = vst [vmem:[#allocation3 + $0x14] sm:$0xf] %v550_v54  ;;  %552 = vst [vmem:[#allocation3 + $0x4] sm:$0xf] %v550_v54  ;;  %v559_v58 = vmax.f32 %v557_v55, %v558_v56  ;;  %v2497_v54 = vld [vmem:[%s3218_s3 + $0x120] ss:$8 sps:$4 sm:$0xff]  }
 0x104   :  { %v388_v59 = vpop.f32.mrf.mxu0 }
 0x105   :  { %v560_v60 = vadd.f32 %v2947_v36, %v559_v58  ;;  %v570_v63 = vmax.f32 %v386_v57, %v388_v59  ;;  %v2505_v57 = vld [vmem:[%s3218_s3 + $0x114] ss:$8 sps:$4 sm:$0xff]  }
 0x106   :  { %v390_v61 = vpop.f32.mrf.mxu0 }
 0x107   :  { %v561_v62 = vmax.f32 %v560_v60, 0.0 }
 0x108   :  { %v392_v0 = vpop.f32.mrf.mxu0 }
 0x109   :  { %v562_v1 = vpack.c.bf16 %v561_v62, %v561_v62  ;;  %v571_v2 = vmax.f32 %v390_v61, %v392_v0  ;;  %v2503_v61 = vld [vmem:[%s3218_s3 + $0x110] ss:$8 sps:$4 sm:$0xff]  }
 0x10a   :  { %v396_v3 = vpop.f32.mrf.mxu0  ;;  %v2464_v15 = vld [vmem:[#allocation3] ss:$20 sps:$4 sm:$0xff]  }
 0x10b   :  { %563 = vst [vmem:[#allocation3 + $0x28] sm:$0xf] %v562_v1  ;;  %564 = vst [vmem:[#allocation3 + $0x18] sm:$0xf] %v562_v1  ;;  %v572_v4 = vmax.f32 %v570_v63, %v571_v2 }
 0x10c   :  { %565 = vst [vmem:[#allocation3 + $0x8] sm:$0xf] %v562_v1  ;;  %v398_v5 = vpop.f32.mrf.mxu0  ;;  %v2509_v1 = vld [vmem:[%s3218_s3 + $0x104] ss:$8 sps:$4 sm:$0xff]  }
 0x10d   :  { %v573_v6 = vadd.f32 %v2947_v36, %v572_v4  ;;  %v584_v9 = vmax.f32 %v396_v3, %v398_v5  ;;  %v2507_v5 = vld [vmem:[%s3218_s3 + $0x100] ss:$8 sps:$4 sm:$0xff]  }
 0x10e   :  { %v400_v7 = vpop.f32.mrf.mxu0 }
 0x10f   :  { %v574_v8 = vmax.f32 %v573_v6, 0.0 }
 0x110   :  { %v402_v10 = vpop.f32.mrf.mxu0 }
 0x111   :  { %v575_v11 = vpack.c.bf16 %v574_v8, %v574_v8  ;;  %v585_v12 = vmax.f32 %v400_v7, %v402_v10  ;;  %v2514_v8 = vld [vmem:[%s3218_s3 + $0x1f4] ss:$8 sps:$4 sm:$0xff]  }
 0x112   :  { %v406_v14 = vpop.f32.mrf.mxu0  ;;  %v2466_v16 = vld [vmem:[#allocation3 + $0x4] ss:$20 sps:$4 sm:$0xff]  }
 0x113   :  { %576 = vst [vmem:[#allocation3 + $0x3c] sm:$0xf] %v575_v11  ;;  %577 = vst [vmem:[#allocation3 + $0x2c] sm:$0xf] %v575_v11  ;;  %v586_v17 = vmax.f32 %v584_v9, %v585_v12  ;;  %1330 = vmatprep.mubr.bf16.mxu1 %v2466_v16  ;;  %v2512_v12 = vld [vmem:[%s3218_s3 + $0x1f0] ss:$8 sps:$4 sm:$0xff]  }
 0x114   :  { %578 = vst [vmem:[#allocation3 + $0x1c] sm:$0xf] %v575_v11  ;;  %579 = vst [vmem:[#allocation3 + $0xc] sm:$0xf] %v575_v11  ;;  %v408_v19 = vpop.f32.mrf.mxu0  ;;  %1331 = vmatmul.mubr.bf16.vlgmr.msra.gmra.mxu1 %v2464_v15 }
 0x115   :  { %v587_v20 = vadd.f32 %v2947_v36, %v586_v17  ;;  %1372 = vmatpush1.bf16.msra.mxu1 %v2467_v13  ;;  %v599_v24 = vmax.f32 %v406_v14, %v408_v19  ;;  %v2518_v17 = vld [vmem:[%s3218_s3 + $0x1e4] ss:$8 sps:$4 sm:$0xff]  }
 0x116   :  { %v410_v21 = vpop.f32.mrf.mxu0  ;;  %1373 = vmatprep.subr.bf16.mxu1 %v2472_v18 }
 0x117   :  { %v588_v23 = vmax.f32 %v587_v20, 0.0 }
 0x118   :  { %v412_v26 = vpop.f32.mrf.mxu0 }
 0x119   :  { %v589_v27 = vpack.c.bf16 %v588_v23, %v588_v23  ;;  %v600_v28 = vmax.f32 %v410_v21, %v412_v26  ;;  %1374 = vmatpush1.bf16.msra.mxu1 %v2470_v22  ;;  %v2516_v21 = vld [vmem:[%s3218_s3 + $0x1e0] ss:$8 sps:$4 sm:$0xff]  }
 0x11a   :  { %v416_v30 = vpop.f32.mrf.mxu0  ;;  %1375 = vmatprep.subr.bf16.mxu1 %v2478_v25  ;;  %v2496_v48 = vld [vmem:[#allocation3 + $0x28] ss:$20 sps:$4 sm:$0xff]  }
 0x11b   :  { %590 = vst [vmem:[#allocation3 + $0x50] sm:$0xf] %v589_v27  ;;  %591 = vst [vmem:[#allocation3 + $0x40] sm:$0xf] %v589_v27  ;;  %v601_v32 = vmax.f32 %v599_v24, %v600_v28  ;;  %v2521_v24 = vld [vmem:[%s3218_s3 + $0x1d4] ss:$8 sps:$4 sm:$0xff]  }
 0x11c   :  { %592 = vst [vmem:[#allocation3 + $0x30] sm:$0xf] %v589_v27  ;;  %593 = vst [vmem:[#allocation3 + $0x20] sm:$0xf] %v589_v27  ;;  %v418_v34 = vpop.f32.mrf.mxu0  ;;  %v2519_v28 = vld [vmem:[%s3218_s3 + $0x1d0] ss:$8 sps:$4 sm:$0xff]  }
 0x11d   :  { %594 = vst [vmem:[#allocation3 + $0x10] sm:$0xf] %v589_v27  ;;  %v602_v35 = vadd.f32 %v2947_v36, %v601_v32  ;;  %1376 = vmatpush1.bf16.msra.mxu1 %v2476_v31  ;;  %v614_v40 = vmax.f32 %v416_v30, %v418_v34 }
 0x11e   :  { %v420_v37 = vpop.f32.mrf.mxu0  ;;  %1377 = vmatprep.subr.bf16.mxu1 %v2484_v33  ;;  %v2525_v33 = vld [vmem:[%s3218_s3 + $0x1c4] ss:$8 sps:$4 sm:$0xff]  }
 0x11f   :  { %v603_v39 = vmax.f32 %v602_v35, 0.0 }
 0x120   :  { %v422_v42 = vpop.f32.mrf.mxu0 }
 0x121   :  { %v604_v43 = vpack.c.bf16 %v603_v39, %v603_v39  ;;  %v615_v44 = vmax.f32 %v420_v37, %v422_v42  ;;  %1378 = vmatpush1.bf16.msra.mxu1 %v2482_v38  ;;  %v2523_v38 = vld [vmem:[%s3218_s3 + $0x1c0] ss:$8 sps:$4 sm:$0xff]  }
 0x122   :  { %v426_v46 = vpop.f32.mrf.mxu0  ;;  %v2488_v47 = vld [vmem:[#allocation3 + $0x2c] ss:$20 sps:$4 sm:$0xff]   ;;  %1379 = vmatprep.subr.bf16.mxu1 %v2492_v41  ;;  %v2530_v41 = vld [vmem:[%s3218_s3 + $0x1b4] ss:$8 sps:$4 sm:$0xff]  }
 0x123   :  { %605 = vst [vmem:[#allocation3 + $0x64] sm:$0xf] %v604_v43  ;;  %606 = vst [vmem:[#allocation3 + $0x54] sm:$0xf] %v604_v43  ;;  %v616_v49 = vmax.f32 %v614_v40, %v615_v44  ;;  %1340 = vmatprep.mubr.bf16.mxu1 %v2488_v47 }
 0x124   :  { %607 = vst [vmem:[#allocation3 + $0x44] sm:$0xf] %v604_v43  ;;  %608 = vst [vmem:[#allocation3 + $0x34] sm:$0xf] %v604_v43  ;;  %v428_v51 = vpop.f32.mrf.mxu0  ;;  %1341 = vmatmul.mubr.bf16.gmra.mxu1 %v2496_v48 }
 0x125   :  { %609 = vst [vmem:[#allocation3 + $0x24] sm:$0xf] %v604_v43  ;;  %v617_v52 = vadd.f32 %v2947_v36, %v616_v49  ;;  %1380 = vmatpush1.bf16.msra.mxu1 %v2490_v45  ;;  %v629_v56 = vmax.f32 %v426_v46, %v428_v51  ;;  %v2528_v45 = vld [vmem:[%s3218_s3 + $0x1b0] ss:$8 sps:$4 sm:$0xff]  }
 0x126   :  { %v430_v53 = vpop.f32.mrf.mxu0  ;;  %1381 = vmatprep.subr.bf16.mxu1 %v2499_v50  ;;  %v2537_v50 = vld [vmem:[%s3218_s3 + $0x1a4] ss:$8 sps:$4 sm:$0xff]  }
 0x127   :  { %v618_v55 = vmax.f32 %v617_v52, 0.0  ;;  %v2534_v52 = vld [vmem:[#allocation3 + $0xc] ss:$20 sps:$4 sm:$0xff]  }
 0x128   :  { %v432_v58 = vpop.f32.mrf.mxu0 }
 0x129   :  { %v619_v59 = vpack.c.bf16 %v618_v55, %v618_v55  ;;  %v630_v60 = vmax.f32 %v430_v53, %v432_v58  ;;  %1382 = vmatpush1.bf16.msra.mxu1 %v2497_v54  ;;  %v2535_v55 = vld [vmem:[%s3218_s3 + $0x1a0] ss:$8 sps:$4 sm:$0xff]   ;;  %v2540_v58 = vld [vmem:[%s3218_s3 + $0x194] ss:$8 sps:$4 sm:$0xff]  }
 0x12a   :  { %v436_v62 = vpop.f32.mrf.mxu0  ;;  %1383 = vmatprep.subr.bf16.mxu1 %v2505_v57  ;;  %v2515_v15 = vld [vmem:[#allocation3 + $0x50] ss:$20 sps:$4 sm:$0xff]  }
 0x12b   :  { %620 = vst [vmem:[#allocation3 + $0x78] sm:$0xf] %v619_v59  ;;  %621 = vst [vmem:[#allocation3 + $0x68] sm:$0xf] %v619_v59  ;;  %v631_v0 = vmax.f32 %v629_v56, %v630_v60 }
 0x12c   :  { %v2506_v63 = vld [vmem:[#allocation3 + $0x10] ss:$20 sps:$4 sm:$0xff]   ;;  %622 = vst [vmem:[#allocation3 + $0x58] sm:$0xf] %v619_v59  ;;  %623 = vst [vmem:[#allocation3 + $0x48] sm:$0xf] %v619_v59  ;;  %v438_v2 = vpop.f32.mrf.mxu0 }
 0x12d   :  { %624 = vst [vmem:[#allocation3 + $0x38] sm:$0xf] %v619_v59  ;;  %1477 = vmatmul.mubr.bf16.vlgmr.msra.gmra.mxu0 %v2506_v63  ;;  %v632_v3 = vadd.f32 %v2947_v36, %v631_v0  ;;  %1384 = vmatpush1.bf16.msra.mxu1 %v2503_v61  ;;  %v644_v7 = vmax.f32 %v436_v62, %v438_v2  ;;  %v2538_v62 = vld [vmem:[%s3218_s3 + $0x190] ss:$8 sps:$4 sm:$0xff]  }
 0x12e   :  { %1486 = vmatprep.mubr.bf16.mxu0 %v2599_v29  ;;  %v440_v4 = vpop.f32.mrf.mxu0  ;;  %1385 = vmatprep.subr.bf16.mxu1 %v2509_v1  ;;  %v2544_v1 = vld [vmem:[%s3218_s3 + $0x184] ss:$8 sps:$4 sm:$0xff]  }
 0x12f   :  { %v633_v6 = vmax.f32 %v632_v3, 0.0  ;;  %v2542_v3 = vld [vmem:[%s3218_s3 + $0x180] ss:$8 sps:$4 sm:$0xff]  }
 0x130   :  { %v442_v9 = vpop.f32.mrf.mxu0 }
 0x131   :  { %v634_v10 = vpack.c.bf16 %v633_v6, %v633_v6  ;;  %v645_v11 = vmax.f32 %v440_v4, %v442_v9  ;;  %1386 = vmatpush1.bf16.msra.mxu1 %v2507_v5  ;;  %v2532_v6 = vld [vmem:[#allocation3 + $0x8] ss:$20 sps:$4 sm:$0xff]   ;;  %v2547_v9 = vld [vmem:[#allocation3 + $0x30] ss:$20 sps:$4 sm:$0xff]  }
 0x132   :  { %v446_v13 = vpop.f32.mrf.mxu0  ;;  %v2510_v14 = vld [vmem:[#allocation3 + $0x54] ss:$20 sps:$4 sm:$0xff]   ;;  %1387 = vmatprep.subr.bf16.mxu1 %v2514_v8 }
 0x133   :  { %635 = vst [vmem:[#allocation3 + $0x8c] sm:$0xf] %v634_v10  ;;  %636 = vst [vmem:[#allocation3 + $0x7c] sm:$0xf] %v634_v10  ;;  %v646_v16 = vmax.f32 %v644_v7, %v645_v11  ;;  %1350 = vmatprep.mubr.bf16.mxu1 %v2510_v14  ;;  %v2545_v7 = vld [vmem:[#allocation3 + $0x34] ss:$20 sps:$4 sm:$0xff]  }
 0x134   :  { %637 = vst [vmem:[#allocation3 + $0x6c] sm:$0xf] %v634_v10  ;;  %638 = vst [vmem:[#allocation3 + $0x5c] sm:$0xf] %v634_v10  ;;  %v448_v18 = vpop.f32.mrf.mxu0  ;;  %1351 = vmatmul.mubr.bf16.gmra.mxu1 %v2515_v15  ;;  %v2557_v14 = vld [vmem:[%s3220_s5 + $0x70] sm:$0xff]  }
 0x135   :  { %639 = vst [vmem:[#allocation3 + $0x4c] sm:$0xf] %v634_v10  ;;  %v647_v19 = vadd.f32 %v2947_v36, %v646_v16  ;;  %1388 = vmatpush2.bf16.msra.mxu1 %v2512_v12  ;;  %v658_v23 = vmax.f32 %v446_v13, %v448_v18  ;;  %v2555_v12 = vld [vmem:[%s3220_s5 + $0x78] sm:$0xff]   ;;  %v2558_v15 = vld [vmem:[%s3220_s5 + $0x30] sm:$0xff]   ;;  %v2559_v16 = vld [vmem:[%s3220_s5 + $0x68] sm:$0xff]  }
 0x136   :  { %v450_v20 = vpop.f32.mrf.mxu0  ;;  %1389 = vmatprep.subr.bf16.mxu1 %v2518_v17  ;;  %v2556_v13 = vld [vmem:[%s3220_s5 + $0x38] sm:$0xff]   ;;  %v2560_v17 = vld [vmem:[%s3220_s5 + $0x28] sm:$0xff]   ;;  %v2561_v18 = vld [vmem:[%s3220_s5 + $0x60] sm:$0xff]  }
 0x137   :  { %v648_v22 = vmax.f32 %v647_v19, 0.0  ;;  %v2562_v19 = vld [vmem:[%s3220_s5 + $0x20] sm:$0xff]  }
 0x138   :  { %v452_v25 = vpop.f32.mrf.mxu0 }
 0x139   :  { %v649_v26 = vpack.c.bf16 %v648_v22, %v648_v22  ;;  %v659_v27 = vmax.f32 %v450_v20, %v452_v25  ;;  %1390 = vmatpush2.bf16.msra.mxu1 %v2516_v21  ;;  %v2563_v20 = vld [vmem:[%s3220_s5 + $0xf8] sm:$0xff]   ;;  %v2568_v25 = vld [vmem:[%s3220_s5 + $0x50] sm:$0xff]  }
 0x13a   :  { %v456_v30 = vpop.f32.mrf.mxu0  ;;  %1391 = vmatprep.subr.bf16.mxu1 %v2521_v24  ;;  %v2531_v48 = vld [vmem:[#allocation3 + $0x78] ss:$20 sps:$4 sm:$0xff]   ;;  %2287 = vmatprep.subr.bf16.mxu0 %v2563_v20  ;;  %v2567_v24 = vld [vmem:[%s3220_s5 + $0xf0] sm:$0xff]  }
 0x13b   :  { %650 = vst [vmem:[#allocation3 + $0x90] sm:$0xf] %v649_v26  ;;  %651 = vst [vmem:[#allocation3 + $0x80] sm:$0xf] %v649_v26  ;;  %v660_v32 = vmax.f32 %v658_v23, %v659_v27  ;;  %v2564_v21 = vld [vmem:[%s3220_s5 + $0x58] sm:$0xff]   ;;  %v2570_v27 = vld [vmem:[%s3220_s5 + $0x10] sm:$0xff]  }
 0x13c   :  { %v2522_v31 = vld [vmem:[#allocation3 + $0x38] ss:$20 sps:$4 sm:$0xff]   ;;  %652 = vst [vmem:[#allocation3 + $0x70] sm:$0xf] %v649_v26  ;;  %653 = vst [vmem:[#allocation3 + $0x60] sm:$0xf] %v649_v26  ;;  %v458_v34 = vpop.f32.mrf.mxu0 }
 0x13d   :  { %1487 = vmatmul.mubr.bf16.gmra.mxu0 %v2522_v31  ;;  %v661_v35 = vadd.f32 %v2947_v36, %v660_v32  ;;  %1392 = vmatpush2.bf16.msra.mxu1 %v2519_v28  ;;  %v671_v40 = vmax.f32 %v456_v30, %v458_v34  ;;  %v2565_v22 = vld [vmem:[%s3220_s5 + $0xb8] sm:$0xff]   ;;  %v2569_v26 = vld [vmem:[%s3220_s5 + $0xb0] sm:$0xff]   ;;  %v2571_v28 = vld [vmem:[%s3220_s5 + $0xe8] sm:$0xff]  }
 0x13e   :  { %1496 = vmatprep.mubr.bf16.mxu0 %v2599_v29  ;;  %v460_v37 = vpop.f32.mrf.mxu0  ;;  %1393 = vmatprep.subr.bf16.mxu1 %v2525_v33  ;;  %v2566_v23 = vld [vmem:[%s3220_s5 + $0x18] sm:$0xff]   ;;  %v2572_v30 = vld [vmem:[%s3220_s5 + $0x48] sm:$0xff]   ;;  %v2575_v33 = vld [vmem:[%s3220_s5 + $0xe0] sm:$0xff]  }
 0x13f   :  { %v662_v39 = vmax.f32 %v661_v35, 0.0  ;;  %2288 = vmatpush3.bf16.msra.mxu0 %v2565_v22  ;;  %v2573_v31 = vld [vmem:[%s3220_s5 + $0xa8] sm:$0xff]   ;;  %v2576_v34 = vld [vmem:[%s3220_s5 + $0x40] sm:$0xff]  }
 0x140   :  { %v462_v42 = vpop.f32.mrf.mxu0  ;;  %2289 = vmatprep.subr.bf16.mxu0 %v2567_v24  ;;  %v2574_v32 = vld [vmem:[%s3220_s5 + $0x8] sm:$0xff]   ;;  %v2577_v35 = vld [vmem:[%s3220_s5 + $0xa0] sm:$0xff]  }
 0x141   :  { %v663_v43 = vpack.c.bf16 %v662_v39, %v662_v39  ;;  %v672_v44 = vmax.f32 %v460_v37, %v462_v42  ;;  %1394 = vmatpush2.bf16.msra.mxu1 %v2523_v38  ;;  %v2578_v37 = vld [vmem:[%s3220_s5] sm:$0xff]   ;;  %v2581_v38 = vld [vmem:[%s3220_s5 + $0xd8] sm:$0xff]   ;;  %v2585_v42 = vld [vmem:[%s3220_s5 + $0xc8] sm:$0xff]  }
 0x142   :  { %v466_v46 = vpop.f32.mrf.mxu0  ;;  %v2526_v47 = vld [vmem:[#allocation3 + $0x7c] ss:$20 sps:$4 sm:$0xff]   ;;  %1395 = vmatprep.subr.bf16.mxu1 %v2530_v41  ;;  %v3165_v24 = vld [vmem:[%s3222_s4] ss:$0 sm:$0xff] }
 0x143   :  { %664 = vst [vmem:[#allocation3 + $0x94] sm:$0xf] %v663_v43  ;;  %665 = vst [vmem:[#allocation3 + $0x84] sm:$0xf] %v663_v43  ;;  %v673_v49 = vmax.f32 %v671_v40, %v672_v44  ;;  %1360 = vmatprep.mubr.bf16.mxu1 %v2526_v47  ;;  %2290 = vmatpush3.bf16.msra.mxu0 %v2569_v26  ;;  %v2582_v39 = vld [vmem:[%s3220_s5 + $0x98] sm:$0xff]   ;;  %v2583_v40 = vld [vmem:[%s3220_s5 + $0xd0] sm:$0xff]  }
 0x144   :  { %666 = vst [vmem:[#allocation3 + $0x74] sm:$0xf] %v663_v43  ;;  %v468_v51 = vpop.f32.mrf.mxu0  ;;  %1361 = vmatmul.mubr.bf16.gmra.mxu1 %v2531_v48  ;;  %2291 = vmatprep.subr.bf16.mxu0 %v2571_v28  ;;  %v2584_v41 = vld [vmem:[%s3220_s5 + $0x90] sm:$0xff]   ;;  %v2586_v43 = vld [vmem:[%s3220_s5 + $0x88] sm:$0xff]   ;;  %v2587_v44 = vld [vmem:[%s3220_s5 + $0xc0] sm:$0xff]  }
 0x145   :  { %v674_v53 = vadd.f32 %v2947_v36, %v673_v49  ;;  %1396 = vmatpush2.bf16.msra.mxu1 %v2528_v45  ;;  %1403 = vmatprep.mubr.bf16.mxu1 %v2534_v52  ;;  %v683_v57 = vmax.f32 %v466_v46, %v468_v51  ;;  %v2588_v45 = vld [vmem:[%s3220_s5 + $0x80] sm:$0xff]   ;;  %v2600_v46 = vmov 0.0  }
 0x146   :  { %v470_v54 = vpop.f32.mrf.mxu0  ;;  %1397 = vmatprep.subr.bf16.mxu1 %v2537_v50 }
 0x147   :  { %v675_v56 = vmax.f32 %v674_v53, 0.0  ;;  %2292 = vmatpush3.bf16.msra.mxu0 %v2573_v31 }
 0x148   :  { %v472_v59 = vpop.f32.mrf.mxu0  ;;  %2293 = vmatprep.subr.bf16.mxu0 %v2575_v33 }
 0x149   :  { %v676_v60 = vpack.c.bf16 %v675_v56, %v675_v56  ;;  %v684_v61 = vmax.f32 %v470_v54, %v472_v59  ;;  %1398 = vmatpush2.bf16.msra.mxu1 %v2535_v55 }
 0x14a   :  { %1399 = vmatprep.subr.bf16.mxu1 %v2540_v58  ;;  %v2554_v11 = vld [vmem:[#allocation3 + $0x80] ss:$20 sps:$4 sm:$0xff]  }
 0x14b   :  { %v2541_v63 = vld [vmem:[#allocation3 + $0x60] ss:$20 sps:$4 sm:$0xff]   ;;  %677 = vst [vmem:[#allocation3 + $0x98] sm:$0xf] %v676_v60  ;;  %678 = vst [vmem:[#allocation3 + $0x88] sm:$0xf] %v676_v60  ;;  %v685_v0 = vmax.f32 %v683_v57, %v684_v61  ;;  %2294 = vmatpush3.bf16.msra.mxu0 %v2577_v35 }
 0x14c   :  { %1497 = vmatmul.mubr.bf16.gmra.mxu0 %v2541_v63  ;;  %2295 = vmatprep.subr.bf16.mxu0 %v2581_v38 }
 0x14d   :  { %v686_v2 = vadd.f32 %v2947_v36, %v685_v0  ;;  %1506 = vmatprep.mubr.bf16.mxu0 %v2599_v29  ;;  %1400 = vmatpush2.bf16.msra.mxu1 %v2538_v62  ;;  %v2549_v36 = vld [vmem:[#allocation3 + $0x5c] ss:$20 sps:$4 sm:$0xff]   ;;  %v2551_v29 = vld [vmem:[#allocation3 + $0x58] ss:$20 sps:$4 sm:$0xff]  }
 0x14e   :  { %1401 = vmatprep.subr.bf16.mxu1 %v2544_v1 }
 0x14f   :  { %v687_v4 = vmax.f32 %v686_v2, 0.0  ;;  %2296 = vmatpush3.bf16.msra.mxu0 %v2582_v39 }
 0x150   :  { %2297 = vmatprep.subr.bf16.mxu0 %v2583_v40 }
 0x151   :  { %v688_v5 = vpack.c.bf16 %v687_v4, %v687_v4  ;;  %1402 = vmatpush2.bf16.msra.mxu1 %v2542_v3 }
 0x152   :  { %v2552_v10 = vld [vmem:[#allocation3 + $0x84] ss:$20 sps:$4 sm:$0xff]   ;;  %2265 = vmatprep.subr.bf16.mxu1 %v2555_v12 }
 0x153   :  { %689 = vst [vmem:[#allocation3 + $0x9c] sm:$0xf] %v688_v5  ;;  %2298 = vmatpush3.bf16.msra.mxu0 %v2584_v41 }
 0x154   :  { %1404 = vmatmul.mubr.bf16.vlgmr.msra.gmra.mxu1 %v2532_v6  ;;  %2299 = vmatprep.subr.bf16.mxu0 %v2585_v42 }
 0x155   :  { %1413 = vmatprep.mubr.bf16.mxu1 %v2545_v7  ;;  %2266 = vmatpush3.bf16.msra.mxu1 %v2556_v13 }
 0x156   :  { %2267 = vmatprep.subr.bf16.mxu1 %v2557_v14 }
 0x157   :  { %2300 = vmatpush3.bf16.msra.mxu0 %v2586_v43 }
 0x158   :  { %2301 = vmatprep.subr.bf16.mxu0 %v2587_v44 }
 0x159   :  { %2268 = vmatpush3.bf16.msra.mxu1 %v2558_v15 }
 0x15a   :  { %v2548_v8 = vld [vmem:[#allocation3 + $0x88] ss:$20 sps:$4 sm:$0xff]   ;;  %2269 = vmatprep.subr.bf16.mxu1 %v2559_v16 }
 0x15b   :  { %1507 = vmatmul.mubr.bf16.gmra.mxu0 %v2548_v8 }
 0x15c   :  { %1414 = vmatmul.mubr.bf16.gmra.mxu1 %v2547_v9  ;;  %2302 = vmatpush3.bf16.msra.mxu0 %v2588_v45 }
 0x15d   :  { %1423 = vmatprep.mubr.bf16.mxu1 %v2549_v36  ;;  %2270 = vmatpush3.bf16.msra.mxu1 %v2560_v17 }
 0x15e   :  { %2271 = vmatprep.subr.bf16.mxu1 %v2561_v18 }
 0x161   :  { %2272 = vmatpush3.bf16.msra.mxu1 %v2562_v19 }
 0x162   :  { %2273 = vmatprep.subr.bf16.mxu1 %v2564_v21 }
 0x164   :  { %1424 = vmatmul.mubr.bf16.gmra.mxu1 %v2551_v29 }
 0x165   :  { %1433 = vmatprep.mubr.bf16.mxu1 %v2552_v10  ;;  %2274 = vmatpush3.bf16.msra.mxu1 %v2566_v23 }
 0x166   :  { %2275 = vmatprep.subr.bf16.mxu1 %v2568_v25 }
 0x169   :  { %2276 = vmatpush3.bf16.msra.mxu1 %v2570_v27 }
 0x16a   :  { %2277 = vmatprep.subr.bf16.mxu1 %v2572_v30 }
 0x16c   :  { %1434 = vmatmul.mubr.bf16.gmra.mxu1 %v2554_v11 }
 0x16d   :  { %2278 = vmatpush3.bf16.msra.mxu1 %v2574_v32 }
 0x16e   :  { %2279 = vmatprep.subr.bf16.mxu1 %v2576_v34 }
 0x171   :  { %2280 = vmatpush3.bf16.msra.mxu1 %v2578_v37 }
 0x172   :  { %2318 = vmatprep.subr.bf16.mxu1 %v2600_v46 }
 0x1d4   :  { %v1332_v47 = vpop.f32.mrf.mxu1 }
 0x1d6   :  { %v1334_v48 = vpop.f32.mrf.mxu1 }
 0x1d8   :  { %v1336_v49 = vpop.f32.mrf.mxu1 }
 0x1da   :  { %v1338_v50 = vpop.f32.mrf.mxu1 }
 0x1e4   :  { %v1342_v51 = vpop.f32.mrf.mxu1 }
 0x1e6   :  { %v1344_v52 = vpop.f32.mrf.mxu1 }
 0x1e8   :  { %v1346_v53 = vpop.f32.mrf.mxu1 }
 0x1ea   :  { %v1348_v54 = vpop.f32.mrf.mxu1 }
 0x1ed   :  { %v1478_v57 = vpop.f32.mrf.mxu0 }
 0x1ef   :  { %v1480_v59 = vpop.f32.mrf.mxu0 }
 0x1f1   :  { %v1482_v61 = vpop.f32.mrf.mxu0 }
 0x1f3   :  { %v1484_v63 = vpop.f32.mrf.mxu0 }
 0x1f4   :  { %v1352_v55 = vpop.f32.mrf.mxu1 }
 0x1f6   :  { %v1354_v56 = vpop.f32.mrf.mxu1 }
 0x1f8   :  { %v1356_v58 = vpop.f32.mrf.mxu1 }
 0x1fa   :  { %v1358_v60 = vpop.f32.mrf.mxu1 }
 0x1fd   :  { %v1488_v1 = vpop.f32.mrf.mxu0 }
 0x1ff   :  { %v1490_v3 = vpop.f32.mrf.mxu0 }
 0x201   :  { %v1492_v5 = vpop.f32.mrf.mxu0 }
 0x203   :  { %v1494_v9 = vpop.f32.mrf.mxu0 }
 0x204   :  { %v3154_v62 = vpop.f32.mrf.mxu1 }
 0x206   :  { %v3156_v0 = vpop.f32.mrf.mxu1 }
 0x208   :  { %v3158_v2 = vpop.f32.mrf.mxu1 }
 0x20a   :  { %v3160_v4 = vpop.f32.mrf.mxu1 }
 0x20c   :  { %v1498_v11 = vpop.f32.mrf.mxu0 }
 0x20e   :  { %v1500_v19 = vpop.f32.mrf.mxu0 }
 0x210   :  { %v1502_v30 = vpop.f32.mrf.mxu0 }
 0x212   :  { %v1504_v41 = vpop.f32.mrf.mxu0 }
 0x214   :  { %v1405_v6 = vpop.f32.mrf.mxu1 }
 0x215   :  { %v1406_v29 = vadd.f32 %v1405_v6, %v1332_v47 }
 0x216   :  { %v1407_v7 = vpop.f32.mrf.mxu1 }
 0x217   :  { %v1408_v8 = vadd.f32 %v1407_v7, %v1334_v48  ;;  %v1479_v16 = vadd.f32 %v1478_v57, %v1406_v29 }
 0x218   :  { %v1409_v36 = vpop.f32.mrf.mxu1 }
 0x219   :  { %v1410_v10 = vadd.f32 %v1409_v36, %v1336_v49  ;;  %v1481_v13 = vadd.f32 %v1480_v59, %v1408_v8 }
 0x21a   :  { %v1411_v12 = vpop.f32.mrf.mxu1 }
 0x21b   :  { %v1412_v14 = vadd.f32 %v1411_v12, %v1338_v50  ;;  %v1483_v17 = vadd.f32 %v1482_v61, %v1410_v10  ;;  %v1544_v21 = vmax.f32 %v1479_v16, %v1481_v13  ;;  %v1508_v48 = vpop.f32.mrf.mxu0 }
 0x21c   :  { %v1415_v15 = vpop.f32.mrf.mxu1 }
 0x21d   :  { %v1485_v18 = vadd.f32 %v1484_v63, %v1412_v14  ;;  %v1416_v27 = vadd.f32 %v1415_v15, %v1342_v51  ;;  %v1510_v61 = vpop.f32.mrf.mxu0 }
 0x21e   :  { %v1417_v20 = vpop.f32.mrf.mxu1 }
 0x21f   :  { %v1545_v22 = vmax.f32 %v1483_v17, %v1485_v18  ;;  %v1418_v23 = vadd.f32 %v1417_v20, %v1344_v52  ;;  %v1489_v38 = vadd.f32 %v1488_v1, %v1416_v27  ;;  %v1512_v29 = vpop.f32.mrf.mxu0 }
 0x220   :  { %v1419_v25 = vpop.f32.mrf.mxu1 }
 0x221   :  { %v1546_v26 = vmax.f32 %v1544_v21, %v1545_v22  ;;  %v1420_v28 = vadd.f32 %v1419_v25, %v1346_v53  ;;  %v1491_v33 = vadd.f32 %v1490_v3, %v1418_v23  ;;  %v1514_v15 = vpop.f32.mrf.mxu0 }
 0x222   :  { %v1421_v31 = vpop.f32.mrf.mxu1 }
 0x223   :  { %v1547_v32 = vadd.f32 %v3165_v24, %v1546_v26  ;;  %v1422_v34 = vadd.f32 %v1421_v31, %v1348_v54  ;;  %v1493_v39 = vadd.f32 %v1492_v5, %v1420_v28  ;;  %v1555_v44 = vmax.f32 %v1489_v38, %v1491_v33  ;;  %v2594_v33 = vld [vmem:[%s3221_s7 + $0x20] sm:$0xff]  }
 0x224   :  { %v1425_v35 = vpop.f32.mrf.mxu1  ;;  %v2598_v38 = vld [vmem:[%s3221_s7] sm:$0xff]  }
 0x225   :  { %v1548_v37 = vmax.f32 %v1547_v32, 0.0  ;;  %v1495_v40 = vadd.f32 %v1494_v9, %v1422_v34  ;;  %v1426_v51 = vadd.f32 %v1425_v35, %v1352_v55  ;;  %v2592_v32 = vld [vmem:[%s3221_s7 + $0x30] sm:$0xff]   ;;  %v2595_v34 = vld [vmem:[%s3221_s7 + $0x18] sm:$0xff]  }
 0x226   :  { %v1427_v42 = vpop.f32.mrf.mxu1  ;;  %v2596_v35 = vld [vmem:[%s3221_s7 + $0x10] sm:$0xff]  }
 0x227   :  { %v1549_v43 = vpack.c.bf16 %v1548_v37, %v1548_v37  ;;  %v1556_v45 = vmax.f32 %v1493_v39, %v1495_v40  ;;  %v1428_v47 = vadd.f32 %v1427_v42, %v1354_v56  ;;  %v1499_v3 = vadd.f32 %v1498_v11, %v1426_v51  ;;  %v2597_v37 = vld [vmem:[%s3221_s7 + $0x8] sm:$0xff]  }
 0x228   :  { %v1429_v49 = vpop.f32.mrf.mxu1 }
 0x229   :  { %1550 = vst [vmem:[#allocation5] sm:$0xf] %v1549_v43  ;;  %v1557_v50 = vmax.f32 %v1555_v44, %v1556_v45  ;;  %v1430_v52 = vadd.f32 %v1429_v49, %v1356_v58  ;;  %v1501_v57 = vadd.f32 %v1500_v19, %v1428_v47  ;;  %v2219_v44 = vld [vmem:[%s3223_s6] ss:$0 sm:$0xff] }
 0x22a   :  { %v1431_v53 = vpop.f32.mrf.mxu1 }
 0x22b   :  { %v1558_v54 = vadd.f32 %v3165_v24, %v1557_v50  ;;  %v1432_v59 = vadd.f32 %v1431_v53, %v1358_v60  ;;  %v1503_v5 = vadd.f32 %v1502_v30, %v1430_v52  ;;  %v1566_v56 = vmax.f32 %v1499_v3, %v1501_v57 }
 0x22c   :  { %v1435_v63 = vpop.f32.mrf.mxu1 }
 0x22d   :  { %v1559_v1 = vmax.f32 %v1558_v54, 0.0  ;;  %v1505_v6 = vadd.f32 %v1504_v41, %v1432_v59  ;;  %v1436_v10 = vadd.f32 %v1435_v63, %v3154_v62 }
 0x22e   :  { %v1437_v7 = vpop.f32.mrf.mxu1 }
 0x22f   :  { %v1560_v8 = vpack.c.bf16 %v1559_v1, %v1559_v1  ;;  %v1567_v9 = vmax.f32 %v1503_v5, %v1505_v6  ;;  %v1438_v36 = vadd.f32 %v1437_v7, %v3156_v0  ;;  %v1509_v17 = vadd.f32 %v1508_v48, %v1436_v10 }
 0x230   :  { %v1439_v55 = vpop.f32.mrf.mxu1 }
 0x231   :  { %1561 = vst [vmem:[#allocation5 + $0x4] sm:$0xf] %v1560_v8  ;;  %v1568_v58 = vmax.f32 %v1566_v56, %v1567_v9  ;;  %v1440_v60 = vadd.f32 %v1439_v55, %v3158_v2  ;;  %v1511_v11 = vadd.f32 %v1510_v61, %v1438_v36  ;;  %v2591_v2 = vld [vmem:[%s3221_s7 + $0x38] sm:$0xff]  }
 0x232   :  { %v1441_v12 = vpop.f32.mrf.mxu1 }
 0x233   :  { %v1569_v13 = vadd.f32 %v3165_v24, %v1568_v58  ;;  %v1442_v14 = vadd.f32 %v1441_v12, %v3160_v4  ;;  %v1513_v18 = vadd.f32 %v1512_v29, %v1440_v60  ;;  %v1577_v20 = vmax.f32 %v1509_v17, %v1511_v11 }
 0x235   :  { %v1570_v16 = vmax.f32 %v1569_v13, 0.0  ;;  %v1515_v19 = vadd.f32 %v1514_v15, %v1442_v14 }
 0x237   :  { %v1571_v0 = vpack.c.bf16 %v1570_v16, %v1570_v16  ;;  %v1578_v21 = vmax.f32 %v1513_v18, %v1515_v19 }
 0x238   :  { %v1584_v22 = vld [vmem:[#allocation5] sm:$0xff] }
 0x239   :  { %1572 = vst [vmem:[#allocation5 + $0x8] sm:$0xf] %v1571_v0  ;;  %v1579_v23 = vmax.f32 %v1577_v20, %v1578_v21  ;;  %v2220_v62 = vcombine.low %v1584_v22, %v1584_v22  ;;  %v2221_v25 = vcombine.high %v1584_v22, %v1584_v22 }
 0x23b   :  { %v1580_v26 = vadd.f32 %v3165_v24, %v1579_v23  ;;  %1895 = vmatprep.mubr.bf16.mxu1 %v2221_v25  ;;  %v2593_v24 = vld [vmem:[%s3221_s7 + $0x28] sm:$0xff]  }
 0x23c   :  { %1896 = vmatmul.mubr.bf16.vlgmr.msra.gmra.mxu1 %v2220_v62 }
 0x23d   :  { %v1581_v4 = vmax.f32 %v1580_v26, 0.0  ;;  %2319 = vmatpush3.bf16.msra.mxu1 %v2591_v2  ;;  %2334 = vmatprep.mubr.msk.bf16.mxu1 %vm2601_vm1, %v2600_v46 }
 0x23e   :  { %2320 = vmatprep.subr.bf16.mxu1 %v2600_v46 }
 0x23f   :  { %v1582_v27 = vpack.c.bf16 %v1581_v4, %v1581_v4 }
 0x241   :  { %1583 = vst [vmem:[#allocation5 + $0xc] sm:$0xf] %v1582_v27  ;;  %2321 = vmatpush3.bf16.msra.mxu1 %v2592_v32 }
 0x242   :  { %2322 = vmatprep.subr.bf16.mxu1 %v2600_v46 }
 0x245   :  { %2323 = vmatpush3.bf16.msra.mxu1 %v2593_v24 }
 0x246   :  { %2324 = vmatprep.subr.bf16.mxu1 %v2600_v46 }
 0x248   :  { %v1585_v28 = vld [vmem:[#allocation5 + $0x8] sm:$0xff] }
 0x249   :  { %v2222_v30 = vcombine.low %v1585_v28, %v1585_v28  ;;  %v2223_v31 = vcombine.high %v1585_v28, %v1585_v28  ;;  %2325 = vmatpush3.bf16.msra.mxu1 %v2594_v33 }
 0x24a   :  { %2326 = vmatprep.subr.bf16.mxu1 %v2600_v46 }
 0x24b   :  { %1935 = vmatprep.mubr.bf16.mxu0 %v2223_v31 }
 0x24c   :  { %1936 = vmatmul.mubr.bf16.vlgmr.msra.gmra.mxu0 %v2222_v30 }
 0x24d   :  { %2327 = vmatpush3.bf16.msra.mxu1 %v2595_v34 }
 0x24e   :  { %2328 = vmatprep.subr.bf16.mxu1 %v2600_v46 }
 0x251   :  { %2329 = vmatpush3.bf16.msra.mxu1 %v2596_v35 }
 0x252   :  { %2330 = vmatprep.subr.bf16.mxu1 %v2600_v46 }
 0x255   :  { %2331 = vmatpush3.bf16.msra.mxu1 %v2597_v37 }
 0x256   :  { %2332 = vmatprep.subr.bf16.mxu1 %v2600_v46  ;;  %v2256_v46 = vld [vmem:[%s3224_s8] ss:$0 sm:$0xff] }
 0x259   :  { %2333 = vmatpush3.bf16.msra.mxu1 %v2598_v38 }
 0x2fc   :  { %v2281_v39 = vpop.f32.mrf.mxu1 }
 0x2fe   :  { %v2282_v40 = vpop.f32.mrf.mxu1 }
 0x2ff   :  { %v2283_v43 = vadd.f32 %v2282_v40, %v2281_v39 }
 0x300   :  { %v2284_v41 = vpop.f32.mrf.mxu1 }
 0x301   :  { %v1898_v48 = vadd.f32 %v2283_v43, %v2219_v44 }
 0x302   :  { %v2285_v42 = vpop.f32.mrf.mxu1 }
 0x30c   :  { %v2303_v45 = vpop.f32.mrf.mxu0 }
 0x30e   :  { %v2304_v47 = vpop.f32.mrf.mxu0 }
 0x30f   :  { %v2305_v49 = vadd.f32 %v2304_v47, %v2303_v45 }
 0x310   :  { %v2306_v50 = vpop.f32.mrf.mxu0 }
 0x311   :  { %v1938_v51 = vadd.f32 %v2305_v49, %v1898_v48 }
 0x312   :  { %v2307_v52 = vpop.f32.mrf.mxu0 }
 0x313   :  { %v1943_v53 = vmax.f32 %v1938_v51, 0.0 }
 0x315   :  { %v1944_v54 = vpack.c.bf16 %v1943_v53, %v1943_v53 }
 0x317   :  { %2335 = vmatmul.mubr.bf16.vlgmr.msra.gmra.mxu1 %v1944_v54 }
 0x3d7   :  { %v2050_v57 = vpop.f32.mrf.mxu1 }
 0x3d8   :  { %v2051_v59 = vadd.f32 %v2256_v46, %v2050_v57 }
 0x3d9   :  { %v2336_v61 = vpop.f32.mrf.mxu1 }
 0x3da   :  { %2056 = vst [vmem:[%s3225_s9] sm:$0xff] %v2051_v59 }
 0x3db   :  { %v2053_v63 = vpop.f32.mrf.mxu1 }
 0x3dd   :  { %v2337_v1 = vpop.f32.mrf.mxu1 }

</bundles_post_ra>
